<compile_context>
chip_gen: v7x
topology: tpu7x:2x2x1
jax: 0.10.0
libtpu: 0.0.40
codegen_flags: <defaults>
</compile_context>

<pallas_src>
import functools

import jax
import jax.numpy as jnp
from jax.experimental import pallas as pl
from jax.experimental.pallas import tpu as pltpu


# ----------------------------------------------------------------------------
# Kernel
# ----------------------------------------------------------------------------
def decoder_kernel(
    x_ref,        # [T*B, I_pad]  time-major flattened (zs ++ ts), zero-padded channels
    mh_ref,       # [T*B, H]      float32 mask, 1.0 where t < lengths[b]
    wi_ref,       # [I_pad, 3H]   fused input->gate weights  (r | z | n)
    bg_ref,       # [1, 3H]       fused bias (b_ir+b_hr | b_iz+b_hz | b_in)
    wh_ref,       # [H, 3H]       fused hidden->gate weights (r | z | n)
    bhn_ref,      # [1, H]        hidden-side n-gate bias b_hn
    w1_ref, b1_ref,   # [H, Hp], [1, Hp]      projection layer 1 (lane padded)
    w2_ref, b2_ref,   # [Hp, O_pad], [1, O_pad]  projection layer 2 (lane padded)
    out_ref,      # [T*B, O_pad]
    g_ref,        # VMEM scratch [T*B, 3H]  input pre-activations (all steps)
    h_all_ref,    # VMEM scratch [T*B, H]   per-step hidden states
    *, batch, seq_len,
):
    H = wh_ref.shape[0]

    # One-shot input-side matmul for every (t, b); hoisted out of the serial
    # recurrence. b_i* and the r/z parts of b_h* are folded into bg.
    g_ref[...] = (
        jnp.dot(x_ref[...], wi_ref[...], preferred_element_type=jnp.float32)
        + bg_ref[...]
    )

    # Loop-invariant loads hoisted out of the recurrence.
    wh = wh_ref[...]
    bhn = bhn_ref[...]

    def step(t, h):
        base = pl.multiple_of(t * batch, batch)
        g_t = g_ref[pl.ds(base, batch), :]                          # [B, 3H]
        hh = jnp.dot(h, wh, preferred_element_type=jnp.float32)     # [B, 3H]
        # Fused r/z sigmoid over the contiguous [:, :2H] block.
        rz = jax.nn.sigmoid(g_t[:, :2 * H] + hh[:, :2 * H])
        r = rz[:, :H]
        z = rz[:, H:]
        # b_hn folded only into the n-gate term (PyTorch GRU semantics).
        n = jnp.tanh(g_t[:, 2 * H:] + r * (hh[:, 2 * H:] + bhn))
        h_new = (1.0 - z) * n + z * h
        # pack_padded_sequence semantics: hidden state only advances while
        # t < lengths[b]. Arithmetic blend on a pre-broadcast [B, H] mask.
        m = mh_ref[pl.ds(base, batch), :]                           # [B, H]
        h_next = h + m * (h_new - h)
        h_all_ref[pl.ds(base, batch), :] = h_next
        return h_next

    jax.lax.fori_loop(0, seq_len, step,
                      jnp.zeros((batch, H), jnp.float32),
                      unroll=min(seq_len, 8))

    # Projection head on all time steps at once (lane-dense intermediates).
    hs = h_all_ref[...]                                             # [T*B, H]
    y1 = jnp.dot(hs, w1_ref[...], preferred_element_type=jnp.float32) + b1_ref[...]
    y1 = jnp.where(y1 > 0, y1, 0.01 * y1)                           # LeakyReLU(0.01)
    # TODO(synk): nn.Dropout(0.1) is identity in eval mode; stochastic
    # training-mode dropout (pltpu.prng_*) intentionally omitted.
    out_ref[...] = (
        jnp.dot(y1, w2_ref[...], preferred_element_type=jnp.float32) + b2_ref[...]
    ).astype(out_ref.dtype)


# ----------------------------------------------------------------------------
# Wrapper
# ----------------------------------------------------------------------------
@functools.partial(jax.jit, static_argnames=("out_dim",))
def decoder_forward(zs, lengths, ts, packed, out_dim):
    """zs: [B, T, latent], lengths: [B] int32, ts: [T] -> [B, T, out_dim]."""
    B, T, Lz = zs.shape
    H = packed["w_h"].shape[0]
    i_pad = packed["w_i"].shape[0]
    h1_pad = packed["w1"].shape[1]
    o_pad = packed["w2"].shape[1]
    gru_in = Lz + 1

    # Pad batch to a multiple of 8 so per-step pl.ds slices are sublane aligned.
    B_pad = ((B + 7) // 8) * 8
    if B_pad != B:
        zs = jnp.pad(zs, ((0, B_pad - B), (0, 0), (0, 0)))
        lengths = jnp.pad(lengths, (0, B_pad - B))

    # ts -> [B, T, 1], concat with zs; time-major; channel dim padded to i_pad.
    ts_b = jnp.broadcast_to(ts.astype(jnp.float32)[None, :, None], (B_pad, T, 1))
    zt = jnp.concatenate([zs.astype(jnp.float32), ts_b], axis=-1)   # [B, T, Lz+1]
    x_tm = jnp.transpose(zt, (1, 0, 2))                             # [T, B, Lz+1]
    x_flat = jnp.pad(x_tm, ((0, 0), (0, 0), (0, i_pad - gru_in))
                     ).reshape(T * B_pad, i_pad)

    # Validity mask (t < lengths[b]); pre-broadcast to H lanes for the kernel.
    mask = (jnp.arange(T)[:, None] < lengths[None, :]).astype(jnp.float32)  # [T, B]
    mask_col = mask.reshape(T * B_pad, 1)
    mask_h = jnp.broadcast_to(mask_col, (T * B_pad, H))

    vmem = lambda: pl.BlockSpec(memory_space=pltpu.MemorySpace.VMEM)

    # VMEM budget (bytes): all-resident activations + scratch + weights.
    est = 4 * (
        T * B_pad * (i_pad + H + 3 * H + H + o_pad)
        + i_pad * 3 * H + H * 3 * H + H * h1_pad + h1_pad * o_pad
        + 8 * (3 * H + H + h1_pad + o_pad)
    )
    vmem_limit = int(min(max(2 * est + (1 << 20), 32 * 1024 * 1024),
                         48 * 1024 * 1024))

    out_flat = pl.pallas_call(
        functools.partial(decoder_kernel, batch=B_pad, seq_len=T),
        out_shape=jax.ShapeDtypeStruct((T * B_pad, o_pad), jnp.float32),
        in_specs=[vmem() for _ in range(10)],
        out_specs=vmem(),
        scratch_shapes=[
            pltpu.VMEM((T * B_pad, 3 * H), jnp.float32),   # input pre-activations
            pltpu.VMEM((T * B_pad, H), jnp.float32),       # per-step hidden states
        ],
        compiler_params=pltpu.CompilerParams(vmem_limit_bytes=vmem_limit),
    )(x_flat, mask_h,
      packed["w_i"], packed["b_g"], packed["w_h"], packed["b_hn"],
      packed["w1"], packed["b1"], packed["w2"], packed["b2"])

    # Slice the lane-padded slab to out_dim FIRST, then mask (pad_packed_sequence
    # zero-padding) and transpose back to batch-major.
    out = out_flat[:, :out_dim] * mask_col                          # [T*B, out_dim]
    out = out.reshape(T, B_pad, out_dim).transpose(1, 0, 2)         # [B_pad, T, O]
    return out[:B]


# ----------------------------------------------------------------------------
# Parameter init (PyTorch-style U(-1/sqrt(H), 1/sqrt(H))) and kernel packing
# ----------------------------------------------------------------------------
def init_raw_params(key, input_size, hidden_size, latent_size):
    gru_in = latent_size + 1
    k = 1.0 / jnp.sqrt(hidden_size)
    shapes = {
        "w_ir": (gru_in, hidden_size), "w_iz": (gru_in, hidden_size),
        "w_in": (gru_in, hidden_size),
        "w_hr": (hidden_size, hidden_size), "w_hz": (hidden_size, hidden_size),
        "w_hn": (hidden_size, hidden_size),
        "b_ir": (hidden_size,), "b_iz": (hidden_size,), "b_in": (hidden_size,),
        "b_hr": (hidden_size,), "b_hz": (hidden_size,), "b_hn": (hidden_size,),
        "w1": (hidden_size, hidden_size), "b1": (hidden_size,),
        "w2": (hidden_size, input_size), "b2": (input_size,),
    }
    keys = jax.random.split(key, len(shapes))
    return {name: jax.random.uniform(kk, shp, jnp.float32, -k, k)
            for kk, (name, shp) in zip(keys, shapes.items())}


def pack_params(raw, lane=128, sub=8):
    """Fuse gate weights/biases, pad GRU input rows to a multiple of 8 and
    lane-pad the projection head so all intermediates are 128-lane dense."""
    H = raw["w_hr"].shape[0]
    gru_in = raw["w_ir"].shape[0]
    out_dim = raw["w2"].shape[1]
    i_pad = ((gru_in + sub - 1) // sub) * sub
    h1_pad = ((H + lane - 1) // lane) * lane
    o_pad = ((out_dim + lane - 1) // lane) * lane
    w_i = jnp.concatenate([raw["w_ir"], raw["w_iz"], raw["w_in"]], axis=1)
    return {
        "w_i": jnp.pad(w_i, ((0, i_pad - gru_in), (0, 0))),
        "b_g": jnp.concatenate([raw["b_ir"] + raw["b_hr"],
                                raw["b_iz"] + raw["b_hz"],
                                raw["b_in"]])[None, :],
        "w_h": jnp.concatenate([raw["w_hr"], raw["w_hz"], raw["w_hn"]], axis=1),
        "b_hn": raw["b_hn"][None, :],
        "w1": jnp.pad(raw["w1"], ((0, 0), (0, h1_pad - H))),
        "b1": jnp.pad(raw["b1"], (0, h1_pad - H))[None, :],
        "w2": jnp.pad(raw["w2"], ((0, h1_pad - H), (0, o_pad - out_dim))),
        "b2": jnp.pad(raw["b2"], (0, o_pad - out_dim))[None, :],
    }


# ----------------------------------------------------------------------------
# Pure-JAX reference (same math, lax.scan) for a correctness check
# ----------------------------------------------------------------------------
def decoder_reference(zs, lengths, ts, p):
    B, T, Lz = zs.shape
    H = p["w_hr"].shape[0]
    ts_b = jnp.broadcast_to(ts.astype(jnp.float32)[None, :, None], (B, T, 1))
    zt = jnp.concatenate([zs, ts_b], axis=-1)
    x_tm = jnp.transpose(zt, (1, 0, 2))                          # [T, B, I_in]

    def step(h, inp):
        x_t, t = inp
        r = jax.nn.sigmoid(x_t @ p["w_ir"] + p["b_ir"] + h @ p["w_hr"] + p["b_hr"])
        z = jax.nn.sigmoid(x_t @ p["w_iz"] + p["b_iz"] + h @ p["w_hz"] + p["b_hz"])
        n = jnp.tanh(x_t @ p["w_in"] + p["b_in"] + r * (h @ p["w_hn"] + p["b_hn"]))
        h_new = (1.0 - z) * n + z * h
        m = (t < lengths)[:, None].astype(jnp.float32)
        h2 = m * h_new + (1.0 - m) * h
        return h2, h2

    _, hs = jax.lax.scan(step, jnp.zeros((B, H), jnp.float32),
                         (x_tm, jnp.arange(T)))                  # hs: [T, B, H]
    y1 = hs @ p["w1"] + p["b1"]
    y1 = jnp.where(y1 > 0, y1, 0.01 * y1)
    out = y1 @ p["w2"] + p["b2"]                                 # [T, B, I]
    mask = (jnp.arange(T)[:, None] < lengths[None, :]).astype(jnp.float32)
    out = out * mask[:, :, None]
    return jnp.transpose(out, (1, 0, 2))                         # [B, T, I]


if __name__ == "__main__":
    B, T = 8, 8                      # batch, padded sequence length
    input_size, hidden_size, latent_size = 2, 32, 16

    root = jax.random.PRNGKey(0)
    k_params, k_z, k_len = jax.random.split(root, 3)

    raw = init_raw_params(k_params, input_size, hidden_size, latent_size)
    packed = pack_params(raw)

    zs = jax.random.normal(k_z, (B, T, latent_size), jnp.float32)
    ts = jnp.linspace(0.0, 1.0, T, dtype=jnp.float32)
    lengths = jax.random.randint(k_len, (B,), 1, T + 1).astype(jnp.int32)

    out = decoder_forward(zs, lengths, ts, packed, out_dim=input_size)
    out = jax.block_until_ready(out)

    ref = decoder_reference(zs, lengths, ts, raw)

    assert out.shape == (B, T, input_size)
    # pad_packed_sequence trims the time axis to max(lengths); compare on that
    # window (lengths are concrete here, so this is a plain Python slice).
    t_max = int(jnp.max(lengths))
    assert jnp.allclose(out[:, :t_max], ref[:, :t_max], atol=1e-4, rtol=1e-4), \
        "mismatch vs reference"
    # Padding region must be exactly zero, as pad_packed_sequence produces.
    assert jnp.allclose(out[:, t_max:], 0.0)

    print("KERNEL_OK")
</pallas_src>

<mosaic_0001>
module attributes {stable_mosaic.version = 11 : i64} {
  func.func @decoder_kernel(%arg0: memref<64x24xf32, #tpu.memory_space<vmem>>, %arg1: memref<64x32xf32, #tpu.memory_space<vmem>>, %arg2: memref<24x96xf32, #tpu.memory_space<vmem>>, %arg3: memref<1x96xf32, #tpu.memory_space<vmem>>, %arg4: memref<32x96xf32, #tpu.memory_space<vmem>>, %arg5: memref<1x32xf32, #tpu.memory_space<vmem>>, %arg6: memref<32x128xf32, #tpu.memory_space<vmem>>, %arg7: memref<1x128xf32, #tpu.memory_space<vmem>>, %arg8: memref<128x128xf32, #tpu.memory_space<vmem>>, %arg9: memref<1x128xf32, #tpu.memory_space<vmem>>, %arg10: memref<64x128xf32, #tpu.memory_space<vmem>>, %arg11: memref<64x96xf32, #tpu.memory_space<vmem>>, %arg12: memref<64x32xf32, #tpu.memory_space<vmem>>) attributes {dimension_semantics = [], scalar_prefetch = 0 : i64, scratch_operands = 2 : i64, tpu.core_type = #tpu.core_type<tc>} {
    %c0 = arith.constant 0 : index
    %c0_0 = arith.constant 0 : index
    %0 = vector.load %arg0[%c0, %c0_0] : memref<64x24xf32, #tpu.memory_space<vmem>>, vector<64x24xf32>
    %c0_1 = arith.constant 0 : index
    %c0_2 = arith.constant 0 : index
    %1 = vector.load %arg2[%c0_1, %c0_2] : memref<24x96xf32, #tpu.memory_space<vmem>>, vector<24x96xf32>
    %cst = arith.constant dense<0.000000e+00> : vector<64x96xf32>
    %2 = tpu.matmul %0, %1, %cst {dimension_numbers = #tpu.dot_dimension_numbers<[1], [0], [0], [1], [0, 0, 1, 1], [], []>} : vector<64x24xf32>, vector<24x96xf32>, vector<64x96xf32> -> vector<64x96xf32>
    %c0_3 = arith.constant 0 : index
    %c0_4 = arith.constant 0 : index
    %3 = vector.load %arg3[%c0_3, %c0_4] : memref<1x96xf32, #tpu.memory_space<vmem>>, vector<1x96xf32>
    %4 = vector.broadcast %3 : vector<1x96xf32> to vector<64x96xf32>
    %5 = arith.addf %2, %4 : vector<64x96xf32>
    %c0_5 = arith.constant 0 : index
    %c0_6 = arith.constant 0 : index
    %6 = vector.load %arg11[%c0_5, %c0_6] : memref<64x96xf32, #tpu.memory_space<vmem>>, vector<64x96xf32>
    tpu.vector_store %arg11[%c0_5, %c0_6], %5 {strides = array<i32>} : memref<64x96xf32, #tpu.memory_space<vmem>>, vector<64x96xf32>,
    %c0_7 = arith.constant 0 : index
    %c0_8 = arith.constant 0 : index
    %7 = vector.load %arg4[%c0_7, %c0_8] : memref<32x96xf32, #tpu.memory_space<vmem>>, vector<32x96xf32>
    %c0_9 = arith.constant 0 : index
    %c0_10 = arith.constant 0 : index
    %8 = vector.load %arg5[%c0_9, %c0_10] : memref<1x32xf32, #tpu.memory_space<vmem>>, vector<1x32xf32>
    %cst_11 = arith.constant 0.000000e+00 : f32
    %9 = vector.broadcast %cst_11 : f32 to vector<8x32xf32>
    %c0_i32 = arith.constant 0 : i32
    %c8_i32 = arith.constant 8 : i32
    %10 = arith.muli %c0_i32, %c8_i32 : i32
    %11 = tpu.assume_multiple %10, 8 : i32
    %12 = arith.index_cast %11 : i32 to index
    %c0_12 = arith.constant 0 : index
    %13 = vector.load %arg11[%12, %c0_12] : memref<64x96xf32, #tpu.memory_space<vmem>>, vector<8x96xf32>
    %cst_13 = arith.constant dense<0.000000e+00> : vector<8x96xf32>
    %14 = tpu.matmul %9, %7, %cst_13 {dimension_numbers = #tpu.dot_dimension_numbers<[1], [0], [0], [1], [0, 0, 1, 1], [], []>} : vector<8x32xf32>, vector<32x96xf32>, vector<8x96xf32> -> vector<8x96xf32>
    %15 = vector.extract_strided_slice %13 {offsets = [0, 0], sizes = [8, 64], strides = [1, 1]} : vector<8x96xf32> to vector<8x64xf32>
    %16 = vector.extract_strided_slice %14 {offsets = [0, 0], sizes = [8, 64], strides = [1, 1]} : vector<8x96xf32> to vector<8x64xf32>
    %17 = arith.addf %15, %16 : vector<8x64xf32>
    %18 = arith.negf %17 : vector<8x64xf32>
    %19 = math.exp %18 : vector<8x64xf32>
    %cst_14 = arith.constant 1.000000e+00 : f32
    %20 = vector.broadcast %cst_14 : f32 to vector<8x64xf32>
    %21 = arith.addf %20, %19 : vector<8x64xf32>
    %22 = arith.divf %20, %21 : vector<8x64xf32>
    %23 = vector.extract_strided_slice %22 {offsets = [0, 0], sizes = [8, 32], strides = [1, 1]} : vector<8x64xf32> to vector<8x32xf32>
    %24 = vector.extract_strided_slice %22 {offsets = [0, 32], sizes = [8, 32], strides = [1, 1]} : vector<8x64xf32> to vector<8x32xf32>
    %25 = vector.extract_strided_slice %13 {offsets = [0, 64], sizes = [8, 32], strides = [1, 1]} : vector<8x96xf32> to vector<8x32xf32>
    %26 = vector.extract_strided_slice %14 {offsets = [0, 64], sizes = [8, 32], strides = [1, 1]} : vector<8x96xf32> to vector<8x32xf32>
    %27 = vector.broadcast %8 : vector<1x32xf32> to vector<8x32xf32>
    %28 = arith.addf %26, %27 : vector<8x32xf32>
    %29 = arith.mulf %23, %28 : vector<8x32xf32>
    %30 = arith.addf %25, %29 : vector<8x32xf32>
    %31 = math.tanh %30 : vector<8x32xf32>
    %cst_15 = arith.constant 1.000000e+00 : f32
    %32 = vector.broadcast %cst_15 : f32 to vector<8x32xf32>
    %33 = arith.subf %32, %24 : vector<8x32xf32>
    %34 = arith.mulf %33, %31 : vector<8x32xf32>
    %35 = arith.mulf %24, %9 : vector<8x32xf32>
    %36 = arith.addf %34, %35 : vector<8x32xf32>
    %37 = arith.index_cast %11 : i32 to index
    %c0_16 = arith.constant 0 : index
    %38 = vector.load %arg1[%37, %c0_16] : memref<64x32xf32, #tpu.memory_space<vmem>>, vector<8x32xf32>
    %39 = arith.subf %36, %9 : vector<8x32xf32>
    %40 = arith.mulf %38, %39 : vector<8x32xf32>
    %41 = arith.addf %9, %40 : vector<8x32xf32>
    %42 = arith.index_cast %11 : i32 to index
    %c0_17 = arith.constant 0 : index
    %43 = vector.load %arg12[%42, %c0_17] : memref<64x32xf32, #tpu.memory_space<vmem>>, vector<8x32xf32>
    tpu.vector_store %arg12[%42, %c0_17], %41 {strides = array<i32>} : memref<64x32xf32, #tpu.memory_space<vmem>>, vector<8x32xf32>,
    %c1_i32 = arith.constant 1 : i32
    %c8_i32_18 = arith.constant 8 : i32
    %44 = arith.muli %c1_i32, %c8_i32_18 : i32
    %45 = tpu.assume_multiple %44, 8 : i32
    %46 = arith.index_cast %45 : i32 to index
    %c0_19 = arith.constant 0 : index
    %47 = vector.load %arg11[%46, %c0_19] : memref<64x96xf32, #tpu.memory_space<vmem>>, vector<8x96xf32>
    %cst_20 = arith.constant dense<0.000000e+00> : vector<8x96xf32>
    %48 = tpu.matmul %41, %7, %cst_20 {dimension_numbers = #tpu.dot_dimension_numbers<[1], [0], [0], [1], [0, 0, 1, 1], [], []>} : vector<8x32xf32>, vector<32x96xf32>, vector<8x96xf32> -> vector<8x96xf32>
    %49 = vector.extract_strided_slice %47 {offsets = [0, 0], sizes = [8, 64], strides = [1, 1]} : vector<8x96xf32> to vector<8x64xf32>
    %50 = vector.extract_strided_slice %48 {offsets = [0, 0], sizes = [8, 64], strides = [1, 1]} : vector<8x96xf32> to vector<8x64xf32>
    %51 = arith.addf %49, %50 : vector<8x64xf32>
    %52 = arith.negf %51 : vector<8x64xf32>
    %53 = math.exp %52 : vector<8x64xf32>
    %cst_21 = arith.constant 1.000000e+00 : f32
    %54 = vector.broadcast %cst_21 : f32 to vector<8x64xf32>
    %55 = arith.addf %54, %53 : vector<8x64xf32>
    %56 = arith.divf %54, %55 : vector<8x64xf32>
    %57 = vector.extract_strided_slice %56 {offsets = [0, 0], sizes = [8, 32], strides = [1, 1]} : vector<8x64xf32> to vector<8x32xf32>
    %58 = vector.extract_strided_slice %56 {offsets = [0, 32], sizes = [8, 32], strides = [1, 1]} : vector<8x64xf32> to vector<8x32xf32>
    %59 = vector.extract_strided_slice %47 {offsets = [0, 64], sizes = [8, 32], strides = [1, 1]} : vector<8x96xf32> to vector<8x32xf32>
    %60 = vector.extract_strided_slice %48 {offsets = [0, 64], sizes = [8, 32], strides = [1, 1]} : vector<8x96xf32> to vector<8x32xf32>
    %61 = vector.broadcast %8 : vector<1x32xf32> to vector<8x32xf32>
    %62 = arith.addf %60, %61 : vector<8x32xf32>
    %63 = arith.mulf %57, %62 : vector<8x32xf32>
    %64 = arith.addf %59, %63 : vector<8x32xf32>
    %65 = math.tanh %64 : vector<8x32xf32>
    %cst_22 = arith.constant 1.000000e+00 : f32
    %66 = vector.broadcast %cst_22 : f32 to vector<8x32xf32>
    %67 = arith.subf %66, %58 : vector<8x32xf32>
    %68 = arith.mulf %67, %65 : vector<8x32xf32>
    %69 = arith.mulf %58, %41 : vector<8x32xf32>
    %70 = arith.addf %68, %69 : vector<8x32xf32>
    %71 = arith.index_cast %45 : i32 to index
    %c0_23 = arith.constant 0 : index
    %72 = vector.load %arg1[%71, %c0_23] : memref<64x32xf32, #tpu.memory_space<vmem>>, vector<8x32xf32>
    %73 = arith.subf %70, %41 : vector<8x32xf32>
    %74 = arith.mulf %72, %73 : vector<8x32xf32>
    %75 = arith.addf %41, %74 : vector<8x32xf32>
    %76 = arith.index_cast %45 : i32 to index
    %c0_24 = arith.constant 0 : index
    %77 = vector.load %arg12[%76, %c0_24] : memref<64x32xf32, #tpu.memory_space<vmem>>, vector<8x32xf32>
    tpu.vector_store %arg12[%76, %c0_24], %75 {strides = array<i32>} : memref<64x32xf32, #tpu.memory_space<vmem>>, vector<8x32xf32>,
    %c2_i32 = arith.constant 2 : i32
    %c8_i32_25 = arith.constant 8 : i32
    %78 = arith.muli %c2_i32, %c8_i32_25 : i32
    %79 = tpu.assume_multiple %78, 8 : i32
    %80 = arith.index_cast %79 : i32 to index
    %c0_26 = arith.constant 0 : index
    %81 = vector.load %arg11[%80, %c0_26] : memref<64x96xf32, #tpu.memory_space<vmem>>, vector<8x96xf32>
    %cst_27 = arith.constant dense<0.000000e+00> : vector<8x96xf32>
    %82 = tpu.matmul %75, %7, %cst_27 {dimension_numbers = #tpu.dot_dimension_numbers<[1], [0], [0], [1], [0, 0, 1, 1], [], []>} : vector<8x32xf32>, vector<32x96xf32>, vector<8x96xf32> -> vector<8x96xf32>
    %83 = vector.extract_strided_slice %81 {offsets = [0, 0], sizes = [8, 64], strides = [1, 1]} : vector<8x96xf32> to vector<8x64xf32>
    %84 = vector.extract_strided_slice %82 {offsets = [0, 0], sizes = [8, 64], strides = [1, 1]} : vector<8x96xf32> to vector<8x64xf32>
    %85 = arith.addf %83, %84 : vector<8x64xf32>
    %86 = arith.negf %85 : vector<8x64xf32>
    %87 = math.exp %86 : vector<8x64xf32>
    %cst_28 = arith.constant 1.000000e+00 : f32
    %88 = vector.broadcast %cst_28 : f32 to vector<8x64xf32>
    %89 = arith.addf %88, %87 : vector<8x64xf32>
    %90 = arith.divf %88, %89 : vector<8x64xf32>
    %91 = vector.extract_strided_slice %90 {offsets = [0, 0], sizes = [8, 32], strides = [1, 1]} : vector<8x64xf32> to vector<8x32xf32>
    %92 = vector.extract_strided_slice %90 {offsets = [0, 32], sizes = [8, 32], strides = [1, 1]} : vector<8x64xf32> to vector<8x32xf32>
    %93 = vector.extract_strided_slice %81 {offsets = [0, 64], sizes = [8, 32], strides = [1, 1]} : vector<8x96xf32> to vector<8x32xf32>
    %94 = vector.extract_strided_slice %82 {offsets = [0, 64], sizes = [8, 32], strides = [1, 1]} : vector<8x96xf32> to vector<8x32xf32>
    %95 = vector.broadcast %8 : vector<1x32xf32> to vector<8x32xf32>
    %96 = arith.addf %94, %95 : vector<8x32xf32>
    %97 = arith.mulf %91, %96 : vector<8x32xf32>
    %98 = arith.addf %93, %97 : vector<8x32xf32>
    %99 = math.tanh %98 : vector<8x32xf32>
    %cst_29 = arith.constant 1.000000e+00 : f32
    %100 = vector.broadcast %cst_29 : f32 to vector<8x32xf32>
    %101 = arith.subf %100, %92 : vector<8x32xf32>
    %102 = arith.mulf %101, %99 : vector<8x32xf32>
    %103 = arith.mulf %92, %75 : vector<8x32xf32>
    %104 = arith.addf %102, %103 : vector<8x32xf32>
    %105 = arith.index_cast %79 : i32 to index
    %c0_30 = arith.constant 0 : index
    %106 = vector.load %arg1[%105, %c0_30] : memref<64x32xf32, #tpu.memory_space<vmem>>, vector<8x32xf32>
    %107 = arith.subf %104, %75 : vector<8x32xf32>
    %108 = arith.mulf %106, %107 : vector<8x32xf32>
    %109 = arith.addf %75, %108 : vector<8x32xf32>
    %110 = arith.index_cast %79 : i32 to index
    %c0_31 = arith.constant 0 : index
    %111 = vector.load %arg12[%110, %c0_31] : memref<64x32xf32, #tpu.memory_space<vmem>>, vector<8x32xf32>
    tpu.vector_store %arg12[%110, %c0_31], %109 {strides = array<i32>} : memref<64x32xf32, #tpu.memory_space<vmem>>, vector<8x32xf32>,
    %c3_i32 = arith.constant 3 : i32
    %c8_i32_32 = arith.constant 8 : i32
    %112 = arith.muli %c3_i32, %c8_i32_32 : i32
    %113 = tpu.assume_multiple %112, 8 : i32
    %114 = arith.index_cast %113 : i32 to index
    %c0_33 = arith.constant 0 : index
    %115 = vector.load %arg11[%114, %c0_33] : memref<64x96xf32, #tpu.memory_space<vmem>>, vector<8x96xf32>
    %cst_34 = arith.constant dense<0.000000e+00> : vector<8x96xf32>
    %116 = tpu.matmul %109, %7, %cst_34 {dimension_numbers = #tpu.dot_dimension_numbers<[1], [0], [0], [1], [0, 0, 1, 1], [], []>} : vector<8x32xf32>, vector<32x96xf32>, vector<8x96xf32> -> vector<8x96xf32>
    %117 = vector.extract_strided_slice %115 {offsets = [0, 0], sizes = [8, 64], strides = [1, 1]} : vector<8x96xf32> to vector<8x64xf32>
    %118 = vector.extract_strided_slice %116 {offsets = [0, 0], sizes = [8, 64], strides = [1, 1]} : vector<8x96xf32> to vector<8x64xf32>
    %119 = arith.addf %117, %118 : vector<8x64xf32>
    %120 = arith.negf %119 : vector<8x64xf32>
    %121 = math.exp %120 : vector<8x64xf32>
    %cst_35 = arith.constant 1.000000e+00 : f32
    %122 = vector.broadcast %cst_35 : f32 to vector<8x64xf32>
    %123 = arith.addf %122, %121 : vector<8x64xf32>
    %124 = arith.divf %122, %123 : vector<8x64xf32>
    %125 = vector.extract_strided_slice %124 {offsets = [0, 0], sizes = [8, 32], strides = [1, 1]} : vector<8x64xf32> to vector<8x32xf32>
    %126 = vector.extract_strided_slice %124 {offsets = [0, 32], sizes = [8, 32], strides = [1, 1]} : vector<8x64xf32> to vector<8x32xf32>
    %127 = vector.extract_strided_slice %115 {offsets = [0, 64], sizes = [8, 32], strides = [1, 1]} : vector<8x96xf32> to vector<8x32xf32>
    %128 = vector.extract_strided_slice %116 {offsets = [0, 64], sizes = [8, 32], strides = [1, 1]} : vector<8x96xf32> to vector<8x32xf32>
    %129 = vector.broadcast %8 : vector<1x32xf32> to vector<8x32xf32>
    %130 = arith.addf %128, %129 : vector<8x32xf32>
    %131 = arith.mulf %125, %130 : vector<8x32xf32>
    %132 = arith.addf %127, %131 : vector<8x32xf32>
    %133 = math.tanh %132 : vector<8x32xf32>
    %cst_36 = arith.constant 1.000000e+00 : f32
    %134 = vector.broadcast %cst_36 : f32 to vector<8x32xf32>
    %135 = arith.subf %134, %126 : vector<8x32xf32>
    %136 = arith.mulf %135, %133 : vector<8x32xf32>
    %137 = arith.mulf %126, %109 : vector<8x32xf32>
    %138 = arith.addf %136, %137 : vector<8x32xf32>
    %139 = arith.index_cast %113 : i32 to index
    %c0_37 = arith.constant 0 : index
    %140 = vector.load %arg1[%139, %c0_37] : memref<64x32xf32, #tpu.memory_space<vmem>>, vector<8x32xf32>
    %141 = arith.subf %138, %109 : vector<8x32xf32>
    %142 = arith.mulf %140, %141 : vector<8x32xf32>
    %143 = arith.addf %109, %142 : vector<8x32xf32>
    %144 = arith.index_cast %113 : i32 to index
    %c0_38 = arith.constant 0 : index
    %145 = vector.load %arg12[%144, %c0_38] : memref<64x32xf32, #tpu.memory_space<vmem>>, vector<8x32xf32>
    tpu.vector_store %arg12[%144, %c0_38], %143 {strides = array<i32>} : memref<64x32xf32, #tpu.memory_space<vmem>>, vector<8x32xf32>,
    %c4_i32 = arith.constant 4 : i32
    %c8_i32_39 = arith.constant 8 : i32
    %146 = arith.muli %c4_i32, %c8_i32_39 : i32
    %147 = tpu.assume_multiple %146, 8 : i32
    %148 = arith.index_cast %147 : i32 to index
    %c0_40 = arith.constant 0 : index
    %149 = vector.load %arg11[%148, %c0_40] : memref<64x96xf32, #tpu.memory_space<vmem>>, vector<8x96xf32>
    %cst_41 = arith.constant dense<0.000000e+00> : vector<8x96xf32>
    %150 = tpu.matmul %143, %7, %cst_41 {dimension_numbers = #tpu.dot_dimension_numbers<[1], [0], [0], [1], [0, 0, 1, 1], [], []>} : vector<8x32xf32>, vector<32x96xf32>, vector<8x96xf32> -> vector<8x96xf32>
    %151 = vector.extract_strided_slice %149 {offsets = [0, 0], sizes = [8, 64], strides = [1, 1]} : vector<8x96xf32> to vector<8x64xf32>
    %152 = vector.extract_strided_slice %150 {offsets = [0, 0], sizes = [8, 64], strides = [1, 1]} : vector<8x96xf32> to vector<8x64xf32>
    %153 = arith.addf %151, %152 : vector<8x64xf32>
    %154 = arith.negf %153 : vector<8x64xf32>
    %155 = math.exp %154 : vector<8x64xf32>
    %cst_42 = arith.constant 1.000000e+00 : f32
    %156 = vector.broadcast %cst_42 : f32 to vector<8x64xf32>
    %157 = arith.addf %156, %155 : vector<8x64xf32>
    %158 = arith.divf %156, %157 : vector<8x64xf32>
    %159 = vector.extract_strided_slice %158 {offsets = [0, 0], sizes = [8, 32], strides = [1, 1]} : vector<8x64xf32> to vector<8x32xf32>
    %160 = vector.extract_strided_slice %158 {offsets = [0, 32], sizes = [8, 32], strides = [1, 1]} : vector<8x64xf32> to vector<8x32xf32>
    %161 = vector.extract_strided_slice %149 {offsets = [0, 64], sizes = [8, 32], strides = [1, 1]} : vector<8x96xf32> to vector<8x32xf32>
    %162 = vector.extract_strided_slice %150 {offsets = [0, 64], sizes = [8, 32], strides = [1, 1]} : vector<8x96xf32> to vector<8x32xf32>
    %163 = vector.broadcast %8 : vector<1x32xf32> to vector<8x32xf32>
    %164 = arith.addf %162, %163 : vector<8x32xf32>
    %165 = arith.mulf %159, %164 : vector<8x32xf32>
    %166 = arith.addf %161, %165 : vector<8x32xf32>
    %167 = math.tanh %166 : vector<8x32xf32>
    %cst_43 = arith.constant 1.000000e+00 : f32
    %168 = vector.broadcast %cst_43 : f32 to vector<8x32xf32>
    %169 = arith.subf %168, %160 : vector<8x32xf32>
    %170 = arith.mulf %169, %167 : vector<8x32xf32>
    %171 = arith.mulf %160, %143 : vector<8x32xf32>
    %172 = arith.addf %170, %171 : vector<8x32xf32>
    %173 = arith.index_cast %147 : i32 to index
    %c0_44 = arith.constant 0 : index
    %174 = vector.load %arg1[%173, %c0_44] : memref<64x32xf32, #tpu.memory_space<vmem>>, vector<8x32xf32>
    %175 = arith.subf %172, %143 : vector<8x32xf32>
    %176 = arith.mulf %174, %175 : vector<8x32xf32>
    %177 = arith.addf %143, %176 : vector<8x32xf32>
    %178 = arith.index_cast %147 : i32 to index
    %c0_45 = arith.constant 0 : index
    %179 = vector.load %arg12[%178, %c0_45] : memref<64x32xf32, #tpu.memory_space<vmem>>, vector<8x32xf32>
    tpu.vector_store %arg12[%178, %c0_45], %177 {strides = array<i32>} : memref<64x32xf32, #tpu.memory_space<vmem>>, vector<8x32xf32>,
    %c5_i32 = arith.constant 5 : i32
    %c8_i32_46 = arith.constant 8 : i32
    %180 = arith.muli %c5_i32, %c8_i32_46 : i32
    %181 = tpu.assume_multiple %180, 8 : i32
    %182 = arith.index_cast %181 : i32 to index
    %c0_47 = arith.constant 0 : index
    %183 = vector.load %arg11[%182, %c0_47] : memref<64x96xf32, #tpu.memory_space<vmem>>, vector<8x96xf32>
    %cst_48 = arith.constant dense<0.000000e+00> : vector<8x96xf32>
    %184 = tpu.matmul %177, %7, %cst_48 {dimension_numbers = #tpu.dot_dimension_numbers<[1], [0], [0], [1], [0, 0, 1, 1], [], []>} : vector<8x32xf32>, vector<32x96xf32>, vector<8x96xf32> -> vector<8x96xf32>
    %185 = vector.extract_strided_slice %183 {offsets = [0, 0], sizes = [8, 64], strides = [1, 1]} : vector<8x96xf32> to vector<8x64xf32>
    %186 = vector.extract_strided_slice %184 {offsets = [0, 0], sizes = [8, 64], strides = [1, 1]} : vector<8x96xf32> to vector<8x64xf32>
    %187 = arith.addf %185, %186 : vector<8x64xf32>
    %188 = arith.negf %187 : vector<8x64xf32>
    %189 = math.exp %188 : vector<8x64xf32>
    %cst_49 = arith.constant 1.000000e+00 : f32
    %190 = vector.broadcast %cst_49 : f32 to vector<8x64xf32>
    %191 = arith.addf %190, %189 : vector<8x64xf32>
    %192 = arith.divf %190, %191 : vector<8x64xf32>
    %193 = vector.extract_strided_slice %192 {offsets = [0, 0], sizes = [8, 32], strides = [1, 1]} : vector<8x64xf32> to vector<8x32xf32>
    %194 = vector.extract_strided_slice %192 {offsets = [0, 32], sizes = [8, 32], strides = [1, 1]} : vector<8x64xf32> to vector<8x32xf32>
    %195 = vector.extract_strided_slice %183 {offsets = [0, 64], sizes = [8, 32], strides = [1, 1]} : vector<8x96xf32> to vector<8x32xf32>
    %196 = vector.extract_strided_slice %184 {offsets = [0, 64], sizes = [8, 32], strides = [1, 1]} : vector<8x96xf32> to vector<8x32xf32>
    %197 = vector.broadcast %8 : vector<1x32xf32> to vector<8x32xf32>
    %198 = arith.addf %196, %197 : vector<8x32xf32>
    %199 = arith.mulf %193, %198 : vector<8x32xf32>
    %200 = arith.addf %195, %199 : vector<8x32xf32>
    %201 = math.tanh %200 : vector<8x32xf32>
    %cst_50 = arith.constant 1.000000e+00 : f32
    %202 = vector.broadcast %cst_50 : f32 to vector<8x32xf32>
    %203 = arith.subf %202, %194 : vector<8x32xf32>
    %204 = arith.mulf %203, %201 : vector<8x32xf32>
    %205 = arith.mulf %194, %177 : vector<8x32xf32>
    %206 = arith.addf %204, %205 : vector<8x32xf32>
    %207 = arith.index_cast %181 : i32 to index
    %c0_51 = arith.constant 0 : index
    %208 = vector.load %arg1[%207, %c0_51] : memref<64x32xf32, #tpu.memory_space<vmem>>, vector<8x32xf32>
    %209 = arith.subf %206, %177 : vector<8x32xf32>
    %210 = arith.mulf %208, %209 : vector<8x32xf32>
    %211 = arith.addf %177, %210 : vector<8x32xf32>
    %212 = arith.index_cast %181 : i32 to index
    %c0_52 = arith.constant 0 : index
    %213 = vector.load %arg12[%212, %c0_52] : memref<64x32xf32, #tpu.memory_space<vmem>>, vector<8x32xf32>
    tpu.vector_store %arg12[%212, %c0_52], %211 {strides = array<i32>} : memref<64x32xf32, #tpu.memory_space<vmem>>, vector<8x32xf32>,
    %c6_i32 = arith.constant 6 : i32
    %c8_i32_53 = arith.constant 8 : i32
    %214 = arith.muli %c6_i32, %c8_i32_53 : i32
    %215 = tpu.assume_multiple %214, 8 : i32
    %216 = arith.index_cast %215 : i32 to index
    %c0_54 = arith.constant 0 : index
    %217 = vector.load %arg11[%216, %c0_54] : memref<64x96xf32, #tpu.memory_space<vmem>>, vector<8x96xf32>
    %cst_55 = arith.constant dense<0.000000e+00> : vector<8x96xf32>
    %218 = tpu.matmul %211, %7, %cst_55 {dimension_numbers = #tpu.dot_dimension_numbers<[1], [0], [0], [1], [0, 0, 1, 1], [], []>} : vector<8x32xf32>, vector<32x96xf32>, vector<8x96xf32> -> vector<8x96xf32>
    %219 = vector.extract_strided_slice %217 {offsets = [0, 0], sizes = [8, 64], strides = [1, 1]} : vector<8x96xf32> to vector<8x64xf32>
    %220 = vector.extract_strided_slice %218 {offsets = [0, 0], sizes = [8, 64], strides = [1, 1]} : vector<8x96xf32> to vector<8x64xf32>
    %221 = arith.addf %219, %220 : vector<8x64xf32>
    %222 = arith.negf %221 : vector<8x64xf32>
    %223 = math.exp %222 : vector<8x64xf32>
    %cst_56 = arith.constant 1.000000e+00 : f32
    %224 = vector.broadcast %cst_56 : f32 to vector<8x64xf32>
    %225 = arith.addf %224, %223 : vector<8x64xf32>
    %226 = arith.divf %224, %225 : vector<8x64xf32>
    %227 = vector.extract_strided_slice %226 {offsets = [0, 0], sizes = [8, 32], strides = [1, 1]} : vector<8x64xf32> to vector<8x32xf32>
    %228 = vector.extract_strided_slice %226 {offsets = [0, 32], sizes = [8, 32], strides = [1, 1]} : vector<8x64xf32> to vector<8x32xf32>
    %229 = vector.extract_strided_slice %217 {offsets = [0, 64], sizes = [8, 32], strides = [1, 1]} : vector<8x96xf32> to vector<8x32xf32>
    %230 = vector.extract_strided_slice %218 {offsets = [0, 64], sizes = [8, 32], strides = [1, 1]} : vector<8x96xf32> to vector<8x32xf32>
    %231 = vector.broadcast %8 : vector<1x32xf32> to vector<8x32xf32>
    %232 = arith.addf %230, %231 : vector<8x32xf32>
    %233 = arith.mulf %227, %232 : vector<8x32xf32>
    %234 = arith.addf %229, %233 : vector<8x32xf32>
    %235 = math.tanh %234 : vector<8x32xf32>
    %cst_57 = arith.constant 1.000000e+00 : f32
    %236 = vector.broadcast %cst_57 : f32 to vector<8x32xf32>
    %237 = arith.subf %236, %228 : vector<8x32xf32>
    %238 = arith.mulf %237, %235 : vector<8x32xf32>
    %239 = arith.mulf %228, %211 : vector<8x32xf32>
    %240 = arith.addf %238, %239 : vector<8x32xf32>
    %241 = arith.index_cast %215 : i32 to index
    %c0_58 = arith.constant 0 : index
    %242 = vector.load %arg1[%241, %c0_58] : memref<64x32xf32, #tpu.memory_space<vmem>>, vector<8x32xf32>
    %243 = arith.subf %240, %211 : vector<8x32xf32>
    %244 = arith.mulf %242, %243 : vector<8x32xf32>
    %245 = arith.addf %211, %244 : vector<8x32xf32>
    %246 = arith.index_cast %215 : i32 to index
    %c0_59 = arith.constant 0 : index
    %247 = vector.load %arg12[%246, %c0_59] : memref<64x32xf32, #tpu.memory_space<vmem>>, vector<8x32xf32>
    tpu.vector_store %arg12[%246, %c0_59], %245 {strides = array<i32>} : memref<64x32xf32, #tpu.memory_space<vmem>>, vector<8x32xf32>,
    %c7_i32 = arith.constant 7 : i32
    %c8_i32_60 = arith.constant 8 : i32
    %248 = arith.muli %c7_i32, %c8_i32_60 : i32
    %249 = tpu.assume_multiple %248, 8 : i32
    %250 = arith.index_cast %249 : i32 to index
    %c0_61 = arith.constant 0 : index
    %251 = vector.load %arg11[%250, %c0_61] : memref<64x96xf32, #tpu.memory_space<vmem>>, vector<8x96xf32>
    %cst_62 = arith.constant dense<0.000000e+00> : vector<8x96xf32>
    %252 = tpu.matmul %245, %7, %cst_62 {dimension_numbers = #tpu.dot_dimension_numbers<[1], [0], [0], [1], [0, 0, 1, 1], [], []>} : vector<8x32xf32>, vector<32x96xf32>, vector<8x96xf32> -> vector<8x96xf32>
    %253 = vector.extract_strided_slice %251 {offsets = [0, 0], sizes = [8, 64], strides = [1, 1]} : vector<8x96xf32> to vector<8x64xf32>
    %254 = vector.extract_strided_slice %252 {offsets = [0, 0], sizes = [8, 64], strides = [1, 1]} : vector<8x96xf32> to vector<8x64xf32>
    %255 = arith.addf %253, %254 : vector<8x64xf32>
    %256 = arith.negf %255 : vector<8x64xf32>
    %257 = math.exp %256 : vector<8x64xf32>
    %cst_63 = arith.constant 1.000000e+00 : f32
    %258 = vector.broadcast %cst_63 : f32 to vector<8x64xf32>
    %259 = arith.addf %258, %257 : vector<8x64xf32>
    %260 = arith.divf %258, %259 : vector<8x64xf32>
    %261 = vector.extract_strided_slice %260 {offsets = [0, 0], sizes = [8, 32], strides = [1, 1]} : vector<8x64xf32> to vector<8x32xf32>
    %262 = vector.extract_strided_slice %260 {offsets = [0, 32], sizes = [8, 32], strides = [1, 1]} : vector<8x64xf32> to vector<8x32xf32>
    %263 = vector.extract_strided_slice %251 {offsets = [0, 64], sizes = [8, 32], strides = [1, 1]} : vector<8x96xf32> to vector<8x32xf32>
    %264 = vector.extract_strided_slice %252 {offsets = [0, 64], sizes = [8, 32], strides = [1, 1]} : vector<8x96xf32> to vector<8x32xf32>
    %265 = vector.broadcast %8 : vector<1x32xf32> to vector<8x32xf32>
    %266 = arith.addf %264, %265 : vector<8x32xf32>
    %267 = arith.mulf %261, %266 : vector<8x32xf32>
    %268 = arith.addf %263, %267 : vector<8x32xf32>
    %269 = math.tanh %268 : vector<8x32xf32>
    %cst_64 = arith.constant 1.000000e+00 : f32
    %270 = vector.broadcast %cst_64 : f32 to vector<8x32xf32>
    %271 = arith.subf %270, %262 : vector<8x32xf32>
    %272 = arith.mulf %271, %269 : vector<8x32xf32>
    %273 = arith.mulf %262, %245 : vector<8x32xf32>
    %274 = arith.addf %272, %273 : vector<8x32xf32>
    %275 = arith.index_cast %249 : i32 to index
    %c0_65 = arith.constant 0 : index
    %276 = vector.load %arg1[%275, %c0_65] : memref<64x32xf32, #tpu.memory_space<vmem>>, vector<8x32xf32>
    %277 = arith.subf %274, %245 : vector<8x32xf32>
    %278 = arith.mulf %276, %277 : vector<8x32xf32>
    %279 = arith.addf %245, %278 : vector<8x32xf32>
    %280 = arith.index_cast %249 : i32 to index
    %c0_66 = arith.constant 0 : index
    %281 = vector.load %arg12[%280, %c0_66] : memref<64x32xf32, #tpu.memory_space<vmem>>, vector<8x32xf32>
    tpu.vector_store %arg12[%280, %c0_66], %279 {strides = array<i32>} : memref<64x32xf32, #tpu.memory_space<vmem>>, vector<8x32xf32>,
    %c8_i32_67 = arith.constant 8 : i32
    %c0_68 = arith.constant 0 : index
    %c0_69 = arith.constant 0 : index
    %282 = vector.load %arg12[%c0_68, %c0_69] : memref<64x32xf32, #tpu.memory_space<vmem>>, vector<64x32xf32>
    %c0_70 = arith.constant 0 : index
    %c0_71 = arith.constant 0 : index
    %283 = vector.load %arg6[%c0_70, %c0_71] : memref<32x128xf32, #tpu.memory_space<vmem>>, vector<32x128xf32>
    %cst_72 = arith.constant dense<0.000000e+00> : vector<64x128xf32>
    %284 = tpu.matmul %282, %283, %cst_72 {dimension_numbers = #tpu.dot_dimension_numbers<[1], [0], [0], [1], [0, 0, 1, 1], [], []>} : vector<64x32xf32>, vector<32x128xf32>, vector<64x128xf32> -> vector<64x128xf32>
    %c0_73 = arith.constant 0 : index
    %c0_74 = arith.constant 0 : index
    %285 = vector.load %arg7[%c0_73, %c0_74] : memref<1x128xf32, #tpu.memory_space<vmem>>, vector<1x128xf32>
    %286 = vector.broadcast %285 : vector<1x128xf32> to vector<64x128xf32>
    %287 = arith.addf %284, %286 : vector<64x128xf32>
    %cst_75 = arith.constant 0.000000e+00 : f32
    %288 = vector.broadcast %cst_75 : f32 to vector<64x128xf32>
    %289 = arith.cmpf ogt, %287, %288 : vector<64x128xf32>
    %cst_76 = arith.constant 0.00999999977 : f32
    %290 = vector.broadcast %cst_76 : f32 to vector<64x128xf32>
    %291 = arith.mulf %290, %287 : vector<64x128xf32>
    %292 = arith.select %289, %287, %291 : vector<64x128xi1>, vector<64x128xf32>
    %c0_77 = arith.constant 0 : index
    %c0_78 = arith.constant 0 : index
    %293 = vector.load %arg8[%c0_77, %c0_78] : memref<128x128xf32, #tpu.memory_space<vmem>>, vector<128x128xf32>
    %cst_79 = arith.constant dense<0.000000e+00> : vector<64x128xf32>
    %294 = tpu.matmul %292, %293, %cst_79 {dimension_numbers = #tpu.dot_dimension_numbers<[1], [0], [0], [1], [0, 0, 1, 1], [], []>} : vector<64x128xf32>, vector<128x128xf32>, vector<64x128xf32> -> vector<64x128xf32>
    %c0_80 = arith.constant 0 : index
    %c0_81 = arith.constant 0 : index
    %295 = vector.load %arg9[%c0_80, %c0_81] : memref<1x128xf32, #tpu.memory_space<vmem>>, vector<1x128xf32>
    %296 = vector.broadcast %295 : vector<1x128xf32> to vector<64x128xf32>
    %297 = arith.addf %294, %296 : vector<64x128xf32>
    %c0_82 = arith.constant 0 : index
    %c0_83 = arith.constant 0 : index
    %298 = vector.load %arg10[%c0_82, %c0_83] : memref<64x128xf32, #tpu.memory_space<vmem>>, vector<64x128xf32>
    tpu.vector_store %arg10[%c0_82, %c0_83], %297 {strides = array<i32>} : memref<64x128xf32, #tpu.memory_space<vmem>>, vector<64x128xf32>,
    return
  }
}

</mosaic_0001>

<bundles_post_ra>
// kernel: decoder_forward.1
= control target key start
LH: loop header
LB: loop body
LE: loop exit
PB: predicated region body
PF: predicated region fallthrough
CT: control target
= control target key end

     0   :  { %vm53_vm0 = vcmask 195584   ;;  %v1884_v2 = vmov 0.0|0.0   ;;  %vm1885_vm1 = vmmov 0   ;;  %v1886_v3 = vmov 0.0   ;;  %s1887_s12 = smov 64   ;;  %s1889_s26 = smov 32   ;;  %s2299_s2 = inlined_call_operand.vmem [shape: f32[24,96], index: 2, kind: input, shape index: {}]   ;;  %s2300_s0 = inlined_call_operand.vmem [shape: f32[64,24], index: 0, kind: input, shape index: {}]   ;;  %s2301_s4 = inlined_call_operand.vmem [shape: f32[32,96], index: 4, kind: input, shape index: {}]   ;;  %s2302_s5 = inlined_call_operand.vmem [shape: f32[1,32], index: 5, kind: input, shape index: {}]   ;;  %s2303_s3 = inlined_call_operand.vmem [shape: f32[1,96], index: 3, kind: input, shape index: {}]   ;;  %s2304_s1 = inlined_call_operand.vmem [shape: f32[64,32], index: 1, kind: input, shape index: {}]   ;;  %s2305_s6 = inlined_call_operand.vmem [shape: f32[32,128], index: 6, kind: input, shape index: {}]   ;;  %s2306_s8 = inlined_call_operand.vmem [shape: f32[128,128], index: 8, kind: input, shape index: {}]   ;;  %s2307_s7 = inlined_call_operand.vmem [shape: f32[1,128], index: 7, kind: input, shape index: {}]   ;;  %s2308_s9 = inlined_call_operand.vmem [shape: f32[1,128], index: 9, kind: input, shape index: {}]   ;;  %s2309_s10 = inlined_call_operand.vmem [shape: f32[64,128], index: 10, kind: output, shape index: {}]  }
   0x1   :  { %v43_v0 = vld [vmem:[%s2299_s2] sm:$0xff]  ;;  %v44_v1 = vld [vmem:[%s2299_s2 + $0x8] sm:$0xff]  ;;  %1760 = vmatprep.subr.bf16.mxu1 %v1884_v2  ;;  %1627 = vmatprep.mubr.msk.f32.mxu1 %vm1885_vm1, %v1886_v3  ;;  %v45_v7 = vld [vmem:[%s2299_s2 + $0x10] sm:$0xff]  ;;  %vm183_vm2 = vcmask 785408   ;;  %vm198_vm3 = vcmask 261120  }
   0x2   :  { %v1738_v4 = vpack.c.bf16 %v44_v1, %v43_v0  ;;  %v35_v5 = vld [vmem:[%s2300_s0] sm:$0xff]  ;;  %v193_v8 = vld [vmem:[%s2301_s4 + $0x8] sm:$0xff]  ;;  %v194_v12 = vld [vmem:[%s2301_s4 + $0x10] sm:$0xff] }
   0x3   :  { %v192_v6 = vld [vmem:[%s2301_s4] sm:$0xff]  ;;  %1574 = vmatprep.mubr.msk.f32.mxu0 %vm53_vm0, %v35_v5  ;;  %v36_v11 = vld [vmem:[%s2300_s0 + $0x8] sm:$0xff]  ;;  %v195_v13 = vld [vmem:[%s2301_s4 + $0x18] sm:$0xff] }
   0x4   :  { %1739 = vmatprep.subr.bf16.mxu0 %v1738_v4  ;;  %v1967_v9 = vpack.c.bf16 %v193_v8, %v192_v6  ;;  %v1449_v10 = vld [vmem:[%s2302_s5] ss:$0 sm:$0xff]  ;;  %v37_v14 = vld [vmem:[%s2300_s0 + $0x10] sm:$0xff]  ;;  %v1989_v15 = vpack.c.bf16 %v195_v13, %v194_v12  ;;  %v38_v16 = vld [vmem:[%s2300_s0 + $0x18] sm:$0xff] }
   0x5   :  { %1741 = vmatpush3.bf16.msra.mxu0 %v1738_v4  ;;  %284 = vrot.lane.b32.xlu0 %v1449_v10, %s1887_s12  ;;  %v39_v17 = vld [vmem:[%s2300_s0 + $0x20] sm:$0xff]  ;;  %v40_v18 = vld [vmem:[%s2300_s0 + $0x28] sm:$0xff]  ;;  %v41_v19 = vld [vmem:[%s2300_s0 + $0x30] sm:$0xff] }
   0x6   :  { %1572 = vmatprep.subr.mxu0 %v45_v7  ;;  %1762 = vmatpush3.bf16.msra.mxu1 %v1967_v9  ;;  %v42_v20 = vld [vmem:[%s2300_s0 + $0x38] sm:$0xff]  ;;  %v1439_v21 = vld [vmem:[%s2303_s3] ss:$0 sm:$0xff]  ;;  %s1888_s3 = smov 96  }
   0x7   :  { %1763 = vmatprep.subr.bf16.mxu1 %v1884_v2  ;;  %v307_v58 = vld [vmem:[%s2304_s1] sm:$0xff] }
   0x9   :  { %1573 = vmatpush3.msra.mxu0 %v45_v7 }
   0xa   :  { %1575 = vmatmul.mubr.msk.f32.vlgmr.msra.gmra.mrb[0].mxu0 %vm53_vm0, %v36_v11  ;;  %1742 = vmatprep.subr.bf16.mxu0 %v1884_v2 }
   0xb   :  { %1744 = vmatpush3.bf16.msra.mxu0 %v1967_v9  ;;  %1577 = vmatprep.mubr.msk.f32.mxu0 %vm53_vm0, %v37_v14 }
   0xc   :  { %1745 = vmatprep.subr.bf16.mxu0 %v1884_v2  ;;  %1765 = vmatpush3.bf16.msra.mxu1 %v1989_v15 }
   0xd   :  { %1772 = vmatprep.subr.bf16.mxu1 %v1884_v2 }
   0xe   :  { %1578 = vmatmul.mubr.msk.f32.gmra.mrb[2].mxu0 %vm53_vm0, %v38_v16 }
   0xf   :  { %1580 = vmatprep.mubr.msk.f32.mxu0 %vm53_vm0, %v39_v17  ;;  %1747 = vmatpush3.bf16.msra.mxu0 %v1989_v15 }
  0x10   :  { %1748 = vmatprep.subr.bf16.mxu0 %v1884_v2 }
  0x12   :  { %1581 = vmatmul.mubr.msk.f32.gmra.mrb[4].mxu0 %vm53_vm0, %v40_v18 }
  0x13   :  { %1583 = vmatprep.mubr.msk.f32.mxu0 %vm53_vm0, %v41_v19 }
  0x16   :  { %1584 = vmatmul.mubr.msk.f32.gmra.mrb[6].mxu0 %vm53_vm0, %v42_v20 }
  0x17   :  { %1594 = vmatprep.mubr.msk.f32.mxu0 %vm1885_vm1, %v1886_v3 }
  0x1a   :  { %1595 = vmatmul.mubr.f32.vlgmr.msra.gmra.mrb[8].mxu0 %v1886_v3 }
  0x1b   :  { %1750 = vmatpush3.bf16.msra.mxu0 %v1967_v9  ;;  %1605 = vmatprep.mubr.msk.f32.mxu0 %vm1885_vm1, %v1886_v3 }
  0x1c   :  { %1751 = vmatprep.subr.bf16.mxu0 %v1884_v2 }
  0x1f   :  { %1753 = vmatpush3.bf16.msra.mxu0 %v1989_v15 }
  0x20   :  { %1754 = vmatprep.subr.bf16.mxu0 %v1884_v2 }
  0x77   :  { %v2036_v38 = vpop.permute.xlu0 %284 }
  0xdd   :  { %v1576_v22 = vpop.f32.mrb[0].mxu0 }
  0xde   :  { %v150_v23 = vadd.f32 %v1576_v22, %v1439_v21  ;;  %v144_v24 = vpop.f32.mrb[1].mxu0  ;;  %v1452_v22 = vld [vmem:[%s2304_s1 + $0x8] sm:$0xff] }
  0xdf   :  { %v145_v25 = vadd.f32 %v1439_v21, %v144_v24 }
  0xe0   :  { %185 = vst.msk [vmem:[#allocation2 + $0x8] sm:$0xff] %vm183_vm2, %v150_v23 }
  0xe1   :  { %184 = vst.msk [vmem:[#allocation2] sm:$0xff] %vm183_vm2, %v145_v25  ;;  %v1579_v26 = vpop.f32.mrb[2].mxu0 }
  0xe2   :  { %v160_v27 = vadd.f32 %v1579_v26, %v1439_v21  ;;  %v154_v28 = vpop.f32.mrb[3].mxu0 }
  0xe3   :  { %v155_v29 = vadd.f32 %v1439_v21, %v154_v28 }
  0xe4   :  { %187 = vst.msk [vmem:[#allocation2 + $0x18] sm:$0xff] %vm183_vm2, %v160_v27 }
  0xe5   :  { %186 = vst.msk [vmem:[#allocation2 + $0x10] sm:$0xff] %vm183_vm2, %v155_v29  ;;  %v1582_v30 = vpop.f32.mrb[4].mxu0 }
  0xe6   :  { %v170_v31 = vadd.f32 %v1582_v30, %v1439_v21  ;;  %v164_v32 = vpop.f32.mrb[5].mxu0 }
  0xe7   :  { %v165_v33 = vadd.f32 %v1439_v21, %v164_v32  ;;  %v316_v0 = vld [vmem:[#allocation2 + $0x8] sm:$0xff] }
  0xe8   :  { %189 = vst.msk [vmem:[#allocation2 + $0x28] sm:$0xff] %vm183_vm2, %v170_v31  ;;  %v197_v42 = vld [vmem:[#allocation2] sm:$0xff] }
  0xe9   :  { %188 = vst.msk [vmem:[#allocation2 + $0x20] sm:$0xff] %vm183_vm2, %v165_v33  ;;  %v1585_v34 = vpop.f32.mrb[6].mxu0 }
  0xea   :  { %v180_v35 = vadd.f32 %v1585_v34, %v1439_v21  ;;  %v174_v36 = vpop.f32.mrb[7].mxu0 }
  0xeb   :  { %v175_v37 = vadd.f32 %v1439_v21, %v174_v36 }
  0xec   :  { %191 = vst.msk [vmem:[#allocation2 + $0x38] sm:$0xff] %vm183_vm2, %v180_v35  ;;  %v432_v29 = vld [vmem:[#allocation2 + $0x10] sm:$0xff] }
  0xed   :  { %190 = vst.msk [vmem:[#allocation2 + $0x30] sm:$0xff] %vm183_vm2, %v175_v37  ;;  %v268_v39 = vpop.f32.mrb[8].mxu0 }
  0xee   :  { %v287_v40 = vadd.f32 %v2036_v38, %v268_v39  ;;  %v1596_v41 = vpop.f32.mrb[9].mxu0  ;;  %v272_v43 = vadd.f32 %v268_v39, %v197_v42 }
  0xf0   :  { %289 = vrot.lane.b32.xlu0 %v287_v40, %s1887_s12  ;;  %v1448_v44 = vmul.f32 -1.442695, %v272_v43 }
  0xf2   :  { %1836 = vpow2.f32 %v1448_v44 }
  0xfc   :  { %v1837_v45 = vpop.eup %1836 }
  0xfd   :  { %v276_v46 = vadd.f32 1.0, %v1837_v45 }
  0xff   :  { %1838 = vrcp.f32 %v276_v46 }
 0x109   :  { %v1839_v47 = vpop.eup %1838 }
 0x10a   :  { %v299_v53 = vsub.f32 1.0, %v1839_v47  ;;  %v305_v55 = vmul.f32 0.0, %v1839_v47 }
 0x162   :  { %v290_v48 = vpop.permute.xlu0 %289 }
 0x163   :  { %v292_v49 = vmul.f32 %v1839_v47, %v290_v48  ;;  %v1455_v48 = vld [vmem:[%s2304_s1 + $0x10] sm:$0xff] }
 0x165   :  { %294 = vrot.lane.b32.xlu1 %v292_v49, %s1887_s12 }
 0x1d7   :  { %v295_v50 = vpop.permute.xlu1 %294 }
 0x1d8   :  { %v297_v51 = vadd.f32 %v295_v50, %v197_v42 }
 0x1da   :  { %1840 = vtanh.f32 %v297_v51 }
 0x1e4   :  { %v1841_v52 = vpop.eup %1840 }
 0x1e5   :  { %301 = vrot.lane.b32.xlu1 %v1841_v52, %s1888_s3 }
 0x257   :  { %v302_v54 = vpop.permute.xlu1 %301 }
 0x258   :  { %v304_v56 = vmul.f32 %v302_v54, %v299_v53 }
 0x25a   :  { %v306_v57 = vadd.f32 %v305_v55, %v304_v56  ;;  %v548_v55 = vld [vmem:[#allocation2 + $0x18] sm:$0xff] }
 0x25c   :  { %309 = vrot.lane.b32.xlu0 %v306_v57, %s1888_s3 }
 0x2ce   :  { %v310_v59 = vpop.permute.xlu0 %309 }
 0x2cf   :  { %v312_v60 = vmul.f32 %v310_v59, %v307_v58 }
 0x2d1   :  { %314 = vst.msk [vmem:[#allocation3] sm:$0xff] %vm198_vm3, %v312_v60  ;;  %1606 = vmatmul.mubr.msk.f32.vlgmr.msra.gmra.mrb[10].mxu0 %vm198_vm3, %v312_v60 }
 0x2d2   :  { %1756 = vmatpush3.bf16.msra.mxu0 %v1967_v9  ;;  %1616 = vmatprep.mubr.msk.f32.mxu0 %vm1885_vm1, %v1886_v3 }
 0x2d3   :  { %1757 = vmatprep.subr.bf16.mxu0 %v1884_v2 }
 0x2d6   :  { %1759 = vmatpush3.bf16.msra.mxu0 %v1989_v15 }
 0x2d7   :  { %1766 = vmatprep.subr.bf16.mxu0 %v1884_v2 }
 0x3a4   :  { %v386_v61 = vpop.f32.mrb[10].mxu0 }
 0x3a5   :  { %v397_v62 = vadd.f32 %v386_v61, %v2036_v38  ;;  %v1607_v63 = vpop.f32.mrb[11].mxu0  ;;  %v390_v1 = vadd.f32 %v386_v61, %v316_v0 }
 0x3a7   :  { %399 = vrot.lane.b32.xlu1 %v397_v62, %s1887_s12  ;;  %v1451_v4 = vmul.f32 -1.442695, %v390_v1 }
 0x3a9   :  { %1842 = vpow2.f32 %v1451_v4 }
 0x3b3   :  { %v1843_v5 = vpop.eup %1842 }
 0x3b4   :  { %v394_v6 = vadd.f32 1.0, %v1843_v5 }
 0x3b6   :  { %1844 = vrcp.f32 %v394_v6 }
 0x3c0   :  { %v1845_v7 = vpop.eup %1844 }
 0x3c1   :  { %v409_v16 = vsub.f32 1.0, %v1845_v7 }
 0x419   :  { %v400_v8 = vpop.permute.xlu1 %399 }
 0x41a   :  { %v402_v10 = vmul.f32 %v1845_v7, %v400_v8 }
 0x41c   :  { %404 = vrot.lane.b32.xlu0 %v402_v10, %s1887_s12 }
 0x420   :  { %415 = vrot.lane.b32.xlu0 %v312_v60, %s1889_s26 }
 0x48e   :  { %v405_v11 = vpop.permute.xlu0 %404 }
 0x48f   :  { %v407_v12 = vadd.f32 %v405_v11, %v316_v0 }
 0x491   :  { %1846 = vtanh.f32 %v407_v12  ;;  %v1458_v12 = vld [vmem:[%s2304_s1 + $0x18] sm:$0xff] }
 0x492   :  { %v416_v14 = vpop.permute.xlu0 %415 }
 0x493   :  { %v418_v18 = vmul.f32 %v1845_v7, %v416_v14 }
 0x49b   :  { %v1847_v13 = vpop.eup %1846 }
 0x49c   :  { %411 = vrot.lane.b32.xlu1 %v1847_v13, %s1888_s3 }
 0x50e   :  { %v412_v17 = vpop.permute.xlu1 %411 }
 0x50f   :  { %v414_v19 = vmul.f32 %v412_v17, %v409_v16 }
 0x511   :  { %v419_v20 = vadd.f32 %v418_v18, %v414_v19 }
 0x513   :  { %v422_v21 = vsub.f32 %v419_v20, %v416_v14  ;;  %v664_v20 = vld [vmem:[#allocation2 + $0x20] sm:$0xff] }
 0x515   :  { %424 = vrot.lane.b32.xlu1 %v422_v21, %s1888_s3 }
 0x587   :  { %v425_v23 = vpop.permute.xlu1 %424 }
 0x588   :  { %v427_v24 = vmul.f32 %v1452_v22, %v425_v23 }
 0x58a   :  { %v428_v25 = vadd.f32 %v427_v24, %v312_v60 }
 0x58c   :  { %430 = vst.msk [vmem:[#allocation3 + $0x8] sm:$0xff] %vm198_vm3, %v428_v25  ;;  %1617 = vmatmul.mubr.msk.f32.vlgmr.msra.gmra.mrb[12].mxu0 %vm198_vm3, %v428_v25 }
 0x58d   :  { %1768 = vmatpush3.bf16.msra.mxu0 %v1967_v9  ;;  %1638 = vmatprep.mubr.msk.f32.mxu0 %vm1885_vm1, %v1886_v3 }
 0x58e   :  { %1769 = vmatprep.subr.bf16.mxu0 %v1884_v2 }
 0x591   :  { %1771 = vmatpush3.bf16.msra.mxu0 %v1989_v15 }
 0x592   :  { %1778 = vmatprep.subr.bf16.mxu0 %v1884_v2 }
 0x65f   :  { %v502_v26 = vpop.f32.mrb[12].mxu0 }
 0x660   :  { %v513_v27 = vadd.f32 %v502_v26, %v2036_v38  ;;  %v1618_v28 = vpop.f32.mrb[13].mxu0  ;;  %v506_v30 = vadd.f32 %v502_v26, %v432_v29 }
 0x662   :  { %515 = vrot.lane.b32.xlu0 %v513_v27, %s1887_s12  ;;  %v1454_v31 = vmul.f32 -1.442695, %v506_v30 }
 0x664   :  { %1848 = vpow2.f32 %v1454_v31 }
 0x66e   :  { %v1849_v32 = vpop.eup %1848 }
 0x66f   :  { %v510_v33 = vadd.f32 1.0, %v1849_v32 }
 0x671   :  { %1850 = vrcp.f32 %v510_v33 }
 0x67b   :  { %v1851_v34 = vpop.eup %1850 }
 0x67c   :  { %v525_v42 = vsub.f32 1.0, %v1851_v34 }
 0x6d4   :  { %v516_v35 = vpop.permute.xlu0 %515 }
 0x6d5   :  { %v518_v36 = vmul.f32 %v1851_v34, %v516_v35 }
 0x6d7   :  { %520 = vrot.lane.b32.xlu1 %v518_v36, %s1887_s12 }
 0x6db   :  { %531 = vrot.lane.b32.xlu1 %v428_v25, %s1889_s26 }
 0x749   :  { %v521_v37 = vpop.permute.xlu1 %520 }
 0x74a   :  { %v523_v39 = vadd.f32 %v521_v37, %v432_v29 }
 0x74c   :  { %1852 = vtanh.f32 %v523_v39  ;;  %v1461_v39 = vld [vmem:[%s2304_s1 + $0x20] sm:$0xff] }
 0x74d   :  { %v532_v41 = vpop.permute.xlu1 %531 }
 0x74e   :  { %v534_v44 = vmul.f32 %v1851_v34, %v532_v41 }
 0x756   :  { %v1853_v40 = vpop.eup %1852 }
 0x757   :  { %527 = vrot.lane.b32.xlu0 %v1853_v40, %s1888_s3 }
 0x7c9   :  { %v528_v43 = vpop.permute.xlu0 %527 }
 0x7ca   :  { %v530_v45 = vmul.f32 %v528_v43, %v525_v42 }
 0x7cc   :  { %v535_v46 = vadd.f32 %v534_v44, %v530_v45 }
 0x7ce   :  { %v538_v47 = vsub.f32 %v535_v46, %v532_v41  ;;  %v780_v46 = vld [vmem:[#allocation2 + $0x28] sm:$0xff] }
 0x7d0   :  { %540 = vrot.lane.b32.xlu0 %v538_v47, %s1888_s3 }
 0x842   :  { %v541_v49 = vpop.permute.xlu0 %540 }
 0x843   :  { %v543_v50 = vmul.f32 %v1455_v48, %v541_v49 }
 0x845   :  { %v544_v51 = vadd.f32 %v543_v50, %v428_v25 }
 0x847   :  { %546 = vst.msk [vmem:[#allocation3 + $0x10] sm:$0xff] %vm198_vm3, %v544_v51  ;;  %1628 = vmatmul.mubr.msk.f32.vlgmr.msra.gmra.mrb[0].mxu1 %vm198_vm3, %v544_v51 }
 0x848   :  { %1774 = vmatpush3.bf16.msra.mxu1 %v1967_v9  ;;  %1649 = vmatprep.mubr.msk.f32.mxu1 %vm1885_vm1, %v1886_v3 }
 0x849   :  { %1775 = vmatprep.subr.bf16.mxu1 %v1884_v2 }
 0x84c   :  { %1777 = vmatpush3.bf16.msra.mxu1 %v1989_v15 }
 0x84d   :  { %1784 = vmatprep.subr.bf16.mxu1 %v1884_v2 }
 0x91a   :  { %v618_v52 = vpop.f32.mrb[0].mxu1 }
 0x91b   :  { %v629_v53 = vadd.f32 %v618_v52, %v2036_v38  ;;  %v1629_v54 = vpop.f32.mrb[1].mxu1  ;;  %v622_v56 = vadd.f32 %v618_v52, %v548_v55 }
 0x91c   :  { %v1136_v54 = vld [vmem:[%s2305_s6 + $0x8] sm:$0xff] }
 0x91d   :  { %631 = vrot.lane.b32.xlu1 %v629_v53, %s1887_s12  ;;  %v1457_v57 = vmul.f32 -1.442695, %v622_v56  ;;  %v1135_v53 = vld [vmem:[%s2305_s6] sm:$0xff] }
 0x91f   :  { %1854 = vpow2.f32 %v1457_v57 }
 0x929   :  { %v1855_v58 = vpop.eup %1854 }
 0x92a   :  { %v626_v59 = vadd.f32 1.0, %v1855_v58 }
 0x92c   :  { %1856 = vrcp.f32 %v626_v59 }
 0x936   :  { %v1857_v60 = vpop.eup %1856 }
 0x937   :  { %v641_v5 = vsub.f32 1.0, %v1857_v60 }
 0x98f   :  { %v632_v61 = vpop.permute.xlu1 %631 }
 0x990   :  { %v634_v62 = vmul.f32 %v1857_v60, %v632_v61 }
 0x992   :  { %636 = vrot.lane.b32.xlu0 %v634_v62, %s1887_s12 }
 0x996   :  { %647 = vrot.lane.b32.xlu0 %v544_v51, %s1889_s26 }
 0xa04   :  { %v637_v63 = vpop.permute.xlu0 %636 }
 0xa05   :  { %v639_v0 = vadd.f32 %v637_v63, %v548_v55  ;;  %v1790_v55 = vpack.c.bf16 %v1136_v54, %v1135_v53  ;;  %v1464_v63 = vld [vmem:[%s2304_s1 + $0x28] sm:$0xff]  ;;  %v1303_v53 = vld [vmem:[%s2306_s8 + $0x20] sm:$0xff] }
 0xa06   :  { %v1304_v54 = vld [vmem:[%s2306_s8 + $0x28] sm:$0xff] }
 0xa07   :  { %1858 = vtanh.f32 %v639_v0 }
 0xa08   :  { %v648_v4 = vpop.permute.xlu0 %647 }
 0xa09   :  { %v650_v7 = vmul.f32 %v1857_v60, %v648_v4 }
 0xa11   :  { %v1859_v1 = vpop.eup %1858 }
 0xa12   :  { %643 = vrot.lane.b32.xlu1 %v1859_v1, %s1888_s3  ;;  %v1137_v1 = vld [vmem:[%s2305_s6 + $0x10] sm:$0xff] }
 0xa84   :  { %v644_v6 = vpop.permute.xlu1 %643 }
 0xa85   :  { %v646_v8 = vmul.f32 %v644_v6, %v641_v5 }
 0xa87   :  { %v651_v10 = vadd.f32 %v650_v7, %v646_v8  ;;  %v1127_v8 = vld [vmem:[#allocation3] sm:$0xff] }
 0xa89   :  { %v654_v11 = vsub.f32 %v651_v10, %v648_v4  ;;  %v1138_v4 = vld [vmem:[%s2305_s6 + $0x18] sm:$0xff]  ;;  %v1128_v10 = vld [vmem:[#allocation3 + $0x8] sm:$0xff] }
 0xa8a   :  { %v1794_v7 = vpack.c.bf16 %v1138_v4, %v1137_v1  ;;  %v1310_v1 = vld [vmem:[%s2306_s8 + $0x58] sm:$0xff] }
 0xa8b   :  { %656 = vrot.lane.b32.xlu1 %v654_v11, %s1888_s3  ;;  %v1129_v11 = vld [vmem:[#allocation3 + $0x10] sm:$0xff] }
 0xafd   :  { %v657_v13 = vpop.permute.xlu1 %656 }
 0xafe   :  { %v659_v14 = vmul.f32 %v1458_v12, %v657_v13 }
 0xb00   :  { %v660_v16 = vadd.f32 %v659_v14, %v544_v51 }
 0xb02   :  { %662 = vst.msk [vmem:[#allocation3 + $0x18] sm:$0xff] %vm198_vm3, %v660_v16  ;;  %1639 = vmatmul.mubr.msk.f32.vlgmr.msra.gmra.mrb[14].mxu0 %vm198_vm3, %v660_v16 }
 0xb03   :  { %1780 = vmatpush3.bf16.msra.mxu0 %v1967_v9  ;;  %1660 = vmatprep.mubr.msk.f32.mxu0 %vm1885_vm1, %v1886_v3 }
 0xb04   :  { %1781 = vmatprep.subr.bf16.mxu0 %v1884_v2 }
 0xb07   :  { %1783 = vmatpush3.bf16.msra.mxu0 %v1989_v15 }
 0xb08   :  { %1791 = vmatprep.subr.bf16.mxu0 %v1790_v55 }
 0xb09   :  { %v1130_v12 = vld [vmem:[#allocation3 + $0x18] sm:$0xff] }
 0xbd5   :  { %v734_v17 = vpop.f32.mrb[14].mxu0 }
 0xbd6   :  { %v745_v18 = vadd.f32 %v734_v17, %v2036_v38  ;;  %v1640_v19 = vpop.f32.mrb[15].mxu0  ;;  %v738_v21 = vadd.f32 %v734_v17, %v664_v20 }
 0xbd8   :  { %747 = vrot.lane.b32.xlu0 %v745_v18, %s1887_s12  ;;  %v1460_v22 = vmul.f32 -1.442695, %v738_v21 }
 0xbda   :  { %1860 = vpow2.f32 %v1460_v22 }
 0xbe4   :  { %v1861_v23 = vpop.eup %1860 }
 0xbe5   :  { %v742_v24 = vadd.f32 1.0, %v1861_v23 }
 0xbe7   :  { %1862 = vrcp.f32 %v742_v24 }
 0xbf1   :  { %v1863_v25 = vpop.eup %1862 }
 0xbf2   :  { %v757_v32 = vsub.f32 1.0, %v1863_v25 }
 0xc4a   :  { %v748_v26 = vpop.permute.xlu0 %747 }
 0xc4b   :  { %v750_v27 = vmul.f32 %v1863_v25, %v748_v26 }
 0xc4d   :  { %752 = vrot.lane.b32.xlu1 %v750_v27, %s1887_s12 }
 0xc51   :  { %763 = vrot.lane.b32.xlu1 %v660_v16, %s1889_s26 }
 0xcbf   :  { %v753_v28 = vpop.permute.xlu1 %752 }
 0xcc0   :  { %v755_v29 = vadd.f32 %v753_v28, %v664_v20 }
 0xcc2   :  { %1864 = vtanh.f32 %v755_v29 }
 0xcc3   :  { %v764_v31 = vpop.permute.xlu1 %763 }
 0xcc4   :  { %v766_v34 = vmul.f32 %v1863_v25, %v764_v31  ;;  %v896_v25 = vld [vmem:[#allocation2 + $0x30] sm:$0xff] }
 0xccc   :  { %v1865_v30 = vpop.eup %1864 }
 0xccd   :  { %759 = vrot.lane.b32.xlu0 %v1865_v30, %s1888_s3 }
 0xd3f   :  { %v760_v33 = vpop.permute.xlu0 %759 }
 0xd40   :  { %v762_v35 = vmul.f32 %v760_v33, %v757_v32 }
 0xd42   :  { %v767_v36 = vadd.f32 %v766_v34, %v762_v35 }
 0xd44   :  { %v770_v37 = vsub.f32 %v767_v36, %v764_v31  ;;  %v1299_v36 = vld [vmem:[%s2306_s8] sm:$0xff] }
 0xd46   :  { %772 = vrot.lane.b32.xlu0 %v770_v37, %s1888_s3  ;;  %v1300_v37 = vld [vmem:[%s2306_s8 + $0x8] sm:$0xff] }
 0xdb8   :  { %v773_v40 = vpop.permute.xlu0 %772 }
 0xdb9   :  { %v775_v41 = vmul.f32 %v1461_v39, %v773_v40  ;;  %v1798_v39 = vpack.c.bf16 %v1300_v37, %v1299_v36 }
 0xdbb   :  { %v776_v42 = vadd.f32 %v775_v41, %v660_v16 }
 0xdbd   :  { %778 = vst.msk [vmem:[#allocation3 + $0x20] sm:$0xff] %vm198_vm3, %v776_v42  ;;  %1650 = vmatmul.mubr.msk.f32.vlgmr.msra.gmra.mrb[2].mxu1 %vm198_vm3, %v776_v42 }
 0xdbe   :  { %1786 = vmatpush3.bf16.msra.mxu1 %v1967_v9  ;;  %1671 = vmatprep.mubr.msk.f32.mxu1 %vm1885_vm1, %v1886_v3 }
 0xdbf   :  { %1787 = vmatprep.subr.bf16.mxu1 %v1884_v2 }
 0xdc2   :  { %1789 = vmatpush3.bf16.msra.mxu1 %v1989_v15 }
 0xdc3   :  { %1799 = vmatprep.subr.bf16.mxu1 %v1798_v39 }
 0xdc4   :  { %v1131_v13 = vld [vmem:[#allocation3 + $0x20] sm:$0xff] }
 0xe90   :  { %v850_v43 = vpop.f32.mrb[2].mxu1 }
 0xe91   :  { %v861_v44 = vadd.f32 %v850_v43, %v2036_v38  ;;  %v1651_v45 = vpop.f32.mrb[3].mxu1  ;;  %v854_v47 = vadd.f32 %v850_v43, %v780_v46 }
 0xe93   :  { %863 = vrot.lane.b32.xlu1 %v861_v44, %s1887_s12  ;;  %v1463_v48 = vmul.f32 -1.442695, %v854_v47  ;;  %v2181_v47 = vld [vmem:[%s2307_s7] ss:$0 sm:$0xff] }
 0xe95   :  { %1866 = vpow2.f32 %v1463_v48 }
 0xe9f   :  { %v1867_v49 = vpop.eup %1866 }
 0xea0   :  { %v858_v50 = vadd.f32 1.0, %v1867_v49  ;;  %v1467_v49 = vld [vmem:[%s2304_s1 + $0x30] sm:$0xff] }
 0xea2   :  { %1868 = vrcp.f32 %v858_v50 }
 0xeac   :  { %v1869_v9 = vpop.eup %1868 }
 0xead   :  { %v873_v57 = vsub.f32 1.0, %v1869_v9 }
 0xf05   :  { %v864_v51 = vpop.permute.xlu1 %863 }
 0xf06   :  { %v866_v3 = vmul.f32 %v1869_v9, %v864_v51  ;;  %v1302_v51 = vld [vmem:[%s2306_s8 + $0x18] sm:$0xff] }
 0xf08   :  { %868 = vrot.lane.b32.xlu0 %v866_v3, %s1887_s12 }
 0xf0c   :  { %879 = vrot.lane.b32.xlu0 %v776_v42, %s1889_s26 }
 0xf7a   :  { %v869_v2 = vpop.permute.xlu0 %868 }
 0xf7b   :  { %v871_v15 = vadd.f32 %v869_v2, %v780_v46 }
 0xf7d   :  { %1870 = vtanh.f32 %v871_v15 }
 0xf7e   :  { %v880_v56 = vpop.permute.xlu0 %879 }
 0xf7f   :  { %v882_v59 = vmul.f32 %v1869_v9, %v880_v56  ;;  %v1301_v9 = vld [vmem:[%s2306_s8 + $0x10] sm:$0xff] }
 0xf87   :  { %v1871_v52 = vpop.eup %1870 }
 0xf88   :  { %875 = vrot.lane.b32.xlu1 %v1871_v52, %s1888_s3  ;;  %v1802_v52 = vpack.c.bf16 %v1302_v51, %v1301_v9 }
 0xffa   :  { %v876_v58 = vpop.permute.xlu1 %875 }
 0xffb   :  { %v878_v60 = vmul.f32 %v876_v58, %v873_v57  ;;  %v1305_v57 = vld [vmem:[%s2306_s8 + $0x30] sm:$0xff]  ;;  %v1306_v58 = vld [vmem:[%s2306_s8 + $0x38] sm:$0xff] }
 0xffd   :  { %v883_v61 = vadd.f32 %v882_v59, %v878_v60  ;;  %v1810_v59 = vpack.c.bf16 %v1306_v58, %v1305_v57 }
 0xfff   :  { %v886_v62 = vsub.f32 %v883_v61, %v880_v56  ;;  %v1806_v56 = vpack.c.bf16 %v1304_v54, %v1303_v53  ;;  %v1307_v61 = vld [vmem:[%s2306_s8 + $0x40] sm:$0xff] }
0x1001   :  { %888 = vrot.lane.b32.xlu1 %v886_v62, %s1888_s3  ;;  %v1308_v62 = vld [vmem:[%s2306_s8 + $0x48] sm:$0xff] }
0x1073   :  { %v889_v0 = vpop.permute.xlu1 %888 }
0x1074   :  { %v891_v5 = vmul.f32 %v1464_v63, %v889_v0  ;;  %v1814_v63 = vpack.c.bf16 %v1308_v62, %v1307_v61  ;;  %v1309_v0 = vld [vmem:[%s2306_s8 + $0x50] sm:$0xff] }
0x1075   :  { %v1818_v4 = vpack.c.bf16 %v1310_v1, %v1309_v0 }
0x1076   :  { %v2143_v6 = vadd.f32 %v891_v5, %v776_v42  ;;  %v1311_v5 = vld [vmem:[%s2306_s8 + $0x60] sm:$0xff] }
0x1078   :  { %894 = vst.msk [vmem:[#allocation3 + $0x28] sm:$0xff] %vm198_vm3, %v2143_v6  ;;  %1661 = vmatmul.mubr.msk.f32.vlgmr.msra.gmra.mrb[16].mxu0 %vm198_vm3, %v2143_v6 }
0x1079   :  { %1793 = vmatpush3.bf16.msra.mxu0 %v1790_v55  ;;  %1682 = vmatprep.mubr.msk.f32.mxu0 %vm198_vm3, %v1127_v8  ;;  %v1313_v8 = vld [vmem:[%s2306_s8 + $0x70] sm:$0xff] }
0x107a   :  { %1795 = vmatprep.subr.bf16.mxu0 %v1794_v7 }
0x107d   :  { %1797 = vmatpush3.bf16.msra.mxu0 %v1794_v7 }
0x107f   :  { %v1132_v14 = vld [vmem:[#allocation3 + $0x28] sm:$0xff] }
0x1080   :  { %1683 = vmatmul.mubr.msk.f32.vlgmr.msra.gmra.mrb[18].mxu0 %vm198_vm3, %v1128_v10  ;;  %v1314_v10 = vld [vmem:[%s2306_s8 + $0x78] sm:$0xff] }
0x1081   :  { %1685 = vmatprep.mubr.msk.f32.mxu0 %vm198_vm3, %v1129_v11  ;;  %v1826_v11 = vpack.c.bf16 %v1314_v10, %v1313_v8 }
0x1084   :  { %1686 = vmatmul.mubr.msk.f32.gmra.mrb[20].mxu0 %vm198_vm3, %v1130_v12 }
0x1085   :  { %1688 = vmatprep.mubr.msk.f32.mxu0 %vm198_vm3, %v1131_v13 }
0x1088   :  { %1689 = vmatmul.mubr.msk.f32.gmra.mrb[22].mxu0 %vm198_vm3, %v1132_v14 }
0x114b   :  { %v966_v16 = vpop.f32.mrb[16].mxu0 }
0x114c   :  { %v977_v17 = vadd.f32 %v966_v16, %v2036_v38  ;;  %v1662_v18 = vpop.f32.mrb[17].mxu0  ;;  %v970_v26 = vadd.f32 %v966_v16, %v896_v25 }
0x114e   :  { %979 = vrot.lane.b32.xlu0 %v977_v17, %s1887_s12  ;;  %v1466_v27 = vmul.f32 -1.442695, %v970_v26 }
0x1150   :  { %1872 = vpow2.f32 %v1466_v27 }
0x1153   :  { %v2157_v19 = vpop.f32.mrb[18].mxu0 }
0x1154   :  { %v1236_v20 = vpop.f32.mrb[19].mxu0  ;;  %v1242_v12 = vadd.f32 %v2157_v19, %v2181_v47 }
0x1155   :  { %v1237_v48 = vadd.f32 %v2181_v47, %v1236_v20 }
0x1156   :  { %v1284_v14 = vmul.f32 0.01, %v1242_v12  ;;  %vm1276_vm5 = vcmp.gt.f32.partialorder %v1242_v12, 0.0 }
0x1157   :  { %v2159_v21 = vpop.f32.mrb[20].mxu0  ;;  %v1283_v3 = vmul.f32 0.01, %v1237_v48  ;;  %vm1275_vm4 = vcmp.gt.f32.partialorder %v1237_v48, 0.0 }
0x1158   :  { %v2161_v22 = vpop.f32.mrb[21].mxu0  ;;  %v1252_v16 = vadd.f32 %v2159_v21, %v2181_v47 }
0x1159   :  { %v1291_v55 = vsel %vm1275_vm4, %v1237_v48, %v1283_v3  ;;  %v1247_v13 = vadd.f32 %v2181_v47, %v2161_v22 }
0x115a   :  { %v1873_v28 = vpop.eup %1872  ;;  %v1286_v20 = vmul.f32 0.01, %v1252_v16  ;;  %vm1278_vm7 = vcmp.gt.f32.partialorder %v1252_v16, 0.0 }
0x115b   :  { %v2163_v23 = vpop.f32.mrb[22].mxu0  ;;  %v974_v29 = vadd.f32 1.0, %v1873_v28  ;;  %v1285_v17 = vmul.f32 0.01, %v1247_v13  ;;  %vm1277_vm6 = vcmp.gt.f32.partialorder %v1247_v13, 0.0 }
0x115c   :  { %v2165_v24 = vpop.f32.mrb[23].mxu0  ;;  %v1262_v19 = vadd.f32 %v2163_v23, %v2181_v47  ;;  %v1294_v21 = vsel %vm1278_vm7, %v1252_v16, %v1286_v20  ;;  %v2252_v23 = vld [vmem:[%s2308_s9] ss:$0 sm:$0xff] }
0x115d   :  { %1874 = vrcp.f32 %v974_v29  ;;  %v1257_v18 = vadd.f32 %v2181_v47, %v2165_v24  ;;  %v1293_v22 = vsel %vm1277_vm6, %v1247_v13, %v1285_v17 }
0x115e   :  { %v1288_v27 = vmul.f32 0.01, %v1262_v19  ;;  %vm1280_vm9 = vcmp.gt.f32.partialorder %v1262_v19, 0.0 }
0x115f   :  { %v1287_v26 = vmul.f32 0.01, %v1257_v18  ;;  %vm1279_vm8 = vcmp.gt.f32.partialorder %v1257_v18, 0.0 }
0x1160   :  { %v1296_v24 = vsel %vm1280_vm9, %v1262_v19, %v1288_v27 }
0x1161   :  { %v1295_v28 = vsel %vm1279_vm8, %v1257_v18, %v1287_v26 }
0x1167   :  { %v1875_v30 = vpop.eup %1874 }
0x1168   :  { %v989_v41 = vsub.f32 1.0, %v1875_v30 }
0x11c0   :  { %v980_v31 = vpop.permute.xlu0 %979 }
0x11c1   :  { %v982_v32 = vmul.f32 %v1875_v30, %v980_v31 }
0x11c3   :  { %984 = vrot.lane.b32.xlu1 %v982_v32, %s1887_s12 }
0x11c7   :  { %995 = vrot.lane.b32.xlu1 %v2143_v6, %s1889_s26 }
0x1235   :  { %v985_v33 = vpop.permute.xlu1 %984 }
0x1236   :  { %v987_v34 = vadd.f32 %v985_v33, %v896_v25  ;;  %v1292_v25 = vsel %vm1276_vm5, %v1242_v12, %v1284_v14 }
0x1238   :  { %1876 = vtanh.f32 %v987_v34 }
0x1239   :  { %v996_v40 = vpop.permute.xlu1 %995 }
0x123a   :  { %v998_v43 = vmul.f32 %v1875_v30, %v996_v40 }
0x1242   :  { %v1877_v35 = vpop.eup %1876 }
0x1243   :  { %991 = vrot.lane.b32.xlu0 %v1877_v35, %s1888_s3 }
0x12b5   :  { %v992_v42 = vpop.permute.xlu0 %991 }
0x12b6   :  { %v994_v44 = vmul.f32 %v992_v42, %v989_v41 }
0x12b8   :  { %v999_v45 = vadd.f32 %v998_v43, %v994_v44  ;;  %v1012_v44 = vld [vmem:[#allocation2 + $0x38] sm:$0xff] }
0x12ba   :  { %v1002_v46 = vsub.f32 %v999_v45, %v996_v40 }
0x12bc   :  { %1004 = vrot.lane.b32.xlu0 %v1002_v46, %s1888_s3 }
0x132e   :  { %v1005_v50 = vpop.permute.xlu0 %1004 }
0x132f   :  { %v1007_v2 = vmul.f32 %v1467_v49, %v1005_v50 }
0x1331   :  { %v2194_v15 = vadd.f32 %v1007_v2, %v2143_v6  ;;  %v1312_v6 = vld [vmem:[%s2306_s8 + $0x68] sm:$0xff] }
0x1332   :  { %v1822_v7 = vpack.c.bf16 %v1312_v6, %v1311_v5 }
0x1333   :  { %1010 = vst.msk [vmem:[#allocation3 + $0x30] sm:$0xff] %vm198_vm3, %v2194_v15  ;;  %1672 = vmatmul.mubr.msk.f32.vlgmr.msra.gmra.mrb[4].mxu1 %vm198_vm3, %v2194_v15 }
0x1334   :  { %1801 = vmatpush3.bf16.msra.mxu1 %v1798_v39  ;;  %1726 = vmatprep.mubr.f32.mxu1 %v1291_v55 }
0x1335   :  { %1803 = vmatprep.subr.bf16.mxu1 %v1802_v52 }
0x1338   :  { %1805 = vmatpush3.bf16.msra.mxu1 %v1802_v52 }
0x1339   :  { %1807 = vmatprep.subr.bf16.mxu1 %v1806_v56 }
0x133a   :  { %v1133_v60 = vld [vmem:[#allocation3 + $0x30] sm:$0xff] }
0x133b   :  { %1691 = vmatprep.mubr.msk.f32.mxu0 %vm198_vm3, %v1133_v60  ;;  %v1470_v60 = vld [vmem:[%s2304_s1 + $0x38] sm:$0xff] }
0x133c   :  { %1809 = vmatpush3.bf16.msra.mxu1 %v1806_v56 }
0x133d   :  { %1811 = vmatprep.subr.bf16.mxu1 %v1810_v59 }
0x1340   :  { %1813 = vmatpush3.bf16.msra.mxu1 %v1810_v59 }
0x1341   :  { %1815 = vmatprep.subr.bf16.mxu1 %v1814_v63 }
0x1344   :  { %1817 = vmatpush3.bf16.msra.mxu1 %v1814_v63 }
0x1345   :  { %1819 = vmatprep.subr.bf16.mxu1 %v1818_v4 }
0x1348   :  { %1821 = vmatpush3.bf16.msra.mxu1 %v1818_v4 }
0x1349   :  { %1823 = vmatprep.subr.bf16.mxu1 %v1822_v7 }
0x134c   :  { %1825 = vmatpush3.bf16.msra.mxu1 %v1822_v7 }
0x134d   :  { %1827 = vmatprep.subr.bf16.mxu1 %v1826_v11 }
0x1350   :  { %1829 = vmatpush3.bf16.msra.mxu1 %v1826_v11 }
0x1353   :  { %1727 = vmatmul.mubr.f32.vlgmr.msra.gmra.mrb[6].mxu1 %v1292_v25 }
0x1354   :  { %1729 = vmatprep.mubr.f32.mxu1 %v1293_v22 }
0x1357   :  { %1730 = vmatmul.mubr.f32.gmra.mrb[8].mxu1 %v1294_v21 }
0x1358   :  { %1732 = vmatprep.mubr.f32.mxu1 %v1295_v28 }
0x135b   :  { %1733 = vmatmul.mubr.f32.gmra.mrb[10].mxu1 %v1296_v24 }
0x1406   :  { %v1082_v29 = vpop.f32.mrb[4].mxu1 }
0x1407   :  { %v1093_v30 = vadd.f32 %v1082_v29, %v2036_v38  ;;  %v1673_v31 = vpop.f32.mrb[5].mxu1  ;;  %v1086_v45 = vadd.f32 %v1082_v29, %v1012_v44 }
0x1409   :  { %1095 = vrot.lane.b32.xlu1 %v1093_v30, %s1887_s12  ;;  %v1469_v46 = vmul.f32 -1.442695, %v1086_v45 }
0x140b   :  { %1878 = vpow2.f32 %v1469_v46 }
0x1415   :  { %v1879_v48 = vpop.eup %1878 }
0x1416   :  { %v1090_v49 = vadd.f32 1.0, %v1879_v48 }
0x1418   :  { %1880 = vrcp.f32 %v1090_v49 }
0x1422   :  { %v1881_v50 = vpop.eup %1880 }
0x1423   :  { %v1105_v54 = vsub.f32 1.0, %v1881_v50 }
0x1426   :  { %v1728_v32 = vpop.f32.mrb[6].mxu1 }
0x1427   :  { %v1394_v33 = vadd.f32 %v1728_v32, %v2252_v23  ;;  %v1388_v34 = vpop.f32.mrb[7].mxu1 }
0x1428   :  { %v1389_v35 = vadd.f32 %v2252_v23, %v1388_v34 }
0x1429   :  { %1428 = vst [vmem:[%s2309_s10 + $0x8] sm:$0xff] %v1394_v33 }
0x142a   :  { %1427 = vst [vmem:[%s2309_s10] sm:$0xff] %v1389_v35  ;;  %v1731_v38 = vpop.f32.mrb[8].mxu1 }
0x142b   :  { %v1404_v36 = vadd.f32 %v1731_v38, %v2252_v23  ;;  %v1398_v37 = vpop.f32.mrb[9].mxu1 }
0x142c   :  { %v1399_v39 = vadd.f32 %v2252_v23, %v1398_v37 }
0x142d   :  { %1430 = vst [vmem:[%s2309_s10 + $0x18] sm:$0xff] %v1404_v36 }
0x142e   :  { %1429 = vst [vmem:[%s2309_s10 + $0x10] sm:$0xff] %v1399_v39  ;;  %v1734_v40 = vpop.f32.mrb[10].mxu1 }
0x142f   :  { %v1414_v41 = vadd.f32 %v1734_v40, %v2252_v23  ;;  %v1408_v42 = vpop.f32.mrb[11].mxu1 }
0x1430   :  { %v1409_v43 = vadd.f32 %v2252_v23, %v1408_v42 }
0x1431   :  { %1432 = vst [vmem:[%s2309_s10 + $0x28] sm:$0xff] %v1414_v41 }
0x1432   :  { %1431 = vst [vmem:[%s2309_s10 + $0x20] sm:$0xff] %v1409_v43 }
0x147b   :  { %v1096_v9 = vpop.permute.xlu1 %1095 }
0x147c   :  { %v1098_v51 = vmul.f32 %v1881_v50, %v1096_v9 }
0x147e   :  { %1100 = vrot.lane.b32.xlu0 %v1098_v51, %s1887_s12 }
0x1482   :  { %1111 = vrot.lane.b32.xlu0 %v2194_v15, %s1889_s26 }
0x14f0   :  { %v1101_v3 = vpop.permute.xlu0 %1100 }
0x14f1   :  { %v1103_v2 = vadd.f32 %v1101_v3, %v1012_v44 }
0x14f3   :  { %1882 = vtanh.f32 %v1103_v2 }
0x14f4   :  { %v1112_v53 = vpop.permute.xlu0 %1111 }
0x14f5   :  { %v1114_v56 = vmul.f32 %v1881_v50, %v1112_v53 }
0x14fd   :  { %v1883_v52 = vpop.eup %1882 }
0x14fe   :  { %1107 = vrot.lane.b32.xlu1 %v1883_v52, %s1888_s3 }
0x1570   :  { %v1108_v55 = vpop.permute.xlu1 %1107 }
0x1571   :  { %v1110_v57 = vmul.f32 %v1108_v55, %v1105_v54 }
0x1573   :  { %v1115_v58 = vadd.f32 %v1114_v56, %v1110_v57 }
0x1575   :  { %v1118_v59 = vsub.f32 %v1115_v58, %v1112_v53 }
0x1577   :  { %1120 = vrot.lane.b32.xlu1 %v1118_v59, %s1888_s3 }
0x15e9   :  { %v1121_v61 = vpop.permute.xlu1 %1120 }
0x15ea   :  { %v1123_v62 = vmul.f32 %v1470_v60, %v1121_v61 }
0x15ec   :  { %v1124_v63 = vadd.f32 %v1123_v62, %v2194_v15 }
0x15ee   :  { %1126 = vst.msk [vmem:[#allocation3 + $0x38] sm:$0xff] %vm198_vm3, %v1124_v63 }
0x15f5   :  { %v1134_v0 = vld [vmem:[#allocation3 + $0x38] sm:$0xff] }
0x15f6   :  { %1692 = vmatmul.mubr.msk.f32.gmra.mrb[24].mxu0 %vm198_vm3, %v1134_v0 }
0x16c9   :  { %v1693_v1 = vpop.f32.mrb[24].mxu0 }
0x16ca   :  { %v1272_v4 = vadd.f32 %v1693_v1, %v2181_v47  ;;  %v1266_v5 = vpop.f32.mrb[25].mxu0 }
0x16cb   :  { %v1267_v6 = vadd.f32 %v2181_v47, %v1266_v5 }
0x16cc   :  { %v1290_v7 = vmul.f32 0.01, %v1272_v4  ;;  %vm1282_vm11 = vcmp.gt.f32.partialorder %v1272_v4, 0.0 }
0x16cd   :  { %v1289_v8 = vmul.f32 0.01, %v1267_v6  ;;  %vm1281_vm10 = vcmp.gt.f32.partialorder %v1267_v6, 0.0 }
0x16ce   :  { %v1298_v11 = vsel %vm1282_vm11, %v1272_v4, %v1290_v7 }
0x16cf   :  { %v1297_v10 = vsel %vm1281_vm10, %v1267_v6, %v1289_v8 }
0x16d0   :  { %1735 = vmatprep.mubr.f32.mxu1 %v1297_v10 }
0x16d1   :  { %1736 = vmatmul.mubr.f32.gmra.mrb[12].mxu1 %v1298_v11 }
0x17a4   :  { %v1737_v15 = vpop.f32.mrb[12].mxu1 }
0x17a5   :  { %v1424_v12 = vadd.f32 %v1737_v15, %v2252_v23  ;;  %v1418_v13 = vpop.f32.mrb[13].mxu1 }
0x17a6   :  { %v1419_v14 = vadd.f32 %v2252_v23, %v1418_v13 }
0x17a7   :  { %1434 = vst [vmem:[%s2309_s10 + $0x38] sm:$0xff] %v1424_v12 }
0x17a8   :  { %1433 = vst [vmem:[%s2309_s10 + $0x30] sm:$0xff] %v1419_v14 }

</bundles_post_ra>
